<compile_context>
chip_gen: v6e
topology: v6e:2x2x1
jax: 0.10.0
libtpu: 0.0.40
codegen_flags: <defaults>
</compile_context>

<pallas_src>
import jax
import jax.numpy as jnp
from jax.experimental import pallas as pl
from jax.experimental.pallas import tpu as pltpu


# ----------------------------------------------------------------------------
# Fused kernel: all convs + ReLU + max-pool + highway + feature2out.
#   e_ref : (R, D)       bf16  flattened embeddings for TB sentences (R=TB*S)
#   w_ref : (F, D, C)    bf16  all conv filters, zero-padded to F=f_max taps
#   bm_ref: (S, C)       f32   conv bias + (-1e30) mask for invalid positions
#   wh/bh : (C, C) bf16 / (1, C) f32   highway linear
#   wo/bo : (C, O) bf16 / (1, O) f32   feature2out linear
#   out   : (TB, O)      f32
#   scr   : (R + pad, D) f32   VMEM halo scratch (tail rows zeroed)
# ----------------------------------------------------------------------------
def fused_disc_kernel(e_ref, w_ref, bm_ref, wh_ref, bh_ref, wo_ref, bo_ref,
                      out_ref, scr_ref):
    R, D = e_ref.shape
    S, C = bm_ref.shape
    TB = R // S
    F = w_ref.shape[0]
    pad = scr_ref.shape[0] - R

    # --- stage embeddings into the f32 halo scratch ---------------------------
    scr_ref[0:R, :] = e_ref[...].astype(jnp.float32)
    scr_ref[R:R + pad, :] = jnp.zeros((pad, D), jnp.float32)

    # --- every conv tap as one offset MXU matmul (f32 accumulation) ----------
    score = jnp.zeros((R, C), jnp.float32)
    for k in range(F):                                   # F is small -> unroll
        x_k = scr_ref[pl.ds(k, R), :].astype(jnp.bfloat16)      # (R, D)
        score = score + jnp.dot(x_k, w_ref[k],
                                preferred_element_type=jnp.float32)

    # bias + validity mask (invalid conv positions -> -1e30 before ReLU, so
    # they become 0 after ReLU and can only tie, never beat, the valid max).
    score = score.reshape(TB, S, C) + bm_ref[...][None, :, :]
    feat = jnp.max(jnp.maximum(score, 0.0), axis=1)             # (TB, C) f32

    # --- highway --------------------------------------------------------------
    h = jnp.dot(feat.astype(wh_ref.dtype), wh_ref[...],
                preferred_element_type=jnp.float32) + bh_ref[...]
    gate = pl.reciprocal(1.0 + jnp.exp(-h), approx=True)        # sigmoid (EUP)
    hw = gate * jnp.maximum(h, 0.0) + (1.0 - gate) * feat

    # --- feature2out (dropout = identity at inference) ------------------------
    out_ref[...] = jnp.dot(hw.astype(wo_ref.dtype), wo_ref[...],
                           preferred_element_type=jnp.float32) + bo_ref[...]


def _pick_tb(B):
    # Largest multiple-of-8 batch tile dividing B while keeping >= 2 grid
    # steps (so megacore has something to split); otherwise take the batch.
    for tb in (256, 128, 64, 32, 16, 8):
        if B % tb == 0 and B // tb >= 2:
            return tb
    return B


def _fused_forward(emb2d, w3d, bias_mask, wh, bh, wo, bo, *, batch):
    BS, D = emb2d.shape
    F, _, C = w3d.shape
    S = bias_mask.shape[0]
    O = wo.shape[1]
    B = batch
    TB = _pick_tb(B)
    assert B % TB == 0
    R = TB * S
    halo = max(8, -(-(F - 1) // 8) * 8)           # tail rows, sublane-aligned

    flops = 2 * B * S * D * C * F + 2 * B * C * C + 2 * B * C * O
    bytes_accessed = (emb2d.size * 2 + w3d.size * 2 + bias_mask.size * 4
                      + wh.size * 2 + bh.size * 4 + wo.size * 2 + bo.size * 4
                      + B * O * 4)

    return pl.pallas_call(
        fused_disc_kernel,
        out_shape=jax.ShapeDtypeStruct((B, O), jnp.float32),
        grid_spec=pltpu.PrefetchScalarGridSpec(
            num_scalar_prefetch=0,
            grid=(B // TB,),
            in_specs=[
                pl.BlockSpec((R, D), lambda i: (i, 0)),        # embeddings (tiled)
                pl.BlockSpec((F, D, C), lambda i: (0, 0, 0)),  # conv weights
                pl.BlockSpec((S, C), lambda i: (0, 0)),        # bias + mask
                pl.BlockSpec((C, C), lambda i: (0, 0)),        # highway W
                pl.BlockSpec((1, C), lambda i: (0, 0)),        # highway b
                pl.BlockSpec((C, O), lambda i: (0, 0)),        # out W
                pl.BlockSpec((1, O), lambda i: (0, 0)),        # out b
            ],
            out_specs=pl.BlockSpec((TB, O), lambda i: (i, 0)),
            scratch_shapes=[pltpu.VMEM((R + halo, D), jnp.float32)],
        ),
        compiler_params=pltpu.CompilerParams(
            dimension_semantics=("parallel",)),    # lets v7x use both TCs
        cost_estimate=pl.CostEstimate(
            flops=flops, transcendentals=B * C,
            bytes_accessed=bytes_accessed),
    )(emb2d, w3d, bias_mask, wh, bh, wo, bo)


# ----------------------------------------------------------------------------
# One-time weight repacking: (f_max, D, C) bf16 conv tensor + validity mask.
# ----------------------------------------------------------------------------
def prepare_params(params, seq_len, filter_sizes):
    f_max = max(filter_sizes)
    D = params["emb_table"].shape[1]

    w_blocks, f_per_chan = [], []
    for w, f in zip(params["conv_ws"], filter_sizes):
        n = w.shape[2]
        w_pad = jnp.zeros((f_max, D, n), jnp.float32).at[:f].set(w)
        w_blocks.append(w_pad)
        f_per_chan.append(jnp.full((n,), f, jnp.int32))
    w_all = jnp.concatenate(w_blocks, axis=2)                    # (f_max, D, C)

    f_per_chan = jnp.concatenate(f_per_chan)                     # (C,)
    pos = jnp.arange(seq_len, dtype=jnp.int32)[:, None]          # (S, 1)
    valid = pos <= (seq_len - f_per_chan)[None, :]               # (S, C)
    bias = jnp.concatenate(params["conv_bs"])[None, :]           # (1, C)
    bias_mask = jnp.where(valid, bias, -1e30).astype(jnp.float32)

    return dict(
        emb_table=params["emb_table"],
        w3d=w_all.astype(jnp.bfloat16),
        bias_mask=bias_mask,
        wh=params["wh"].astype(jnp.bfloat16), bh=params["bh"],
        wo=params["wo"].astype(jnp.bfloat16), bo=params["bo"],
    )


# ----------------------------------------------------------------------------
# Forward: embedding gather (XLA) + fused kernel (everything else).
# ----------------------------------------------------------------------------
@jax.jit
def cnn_discriminator_forward(inp, prep):
    # TODO(synk): the embedding gather could move in-kernel via scalar-prefetch
    # of `inp` + manual DMA row gather when S*D gets large.
    emb = prep["emb_table"][inp]                                 # (B, S, D) f32
    B, S, D = emb.shape
    emb2d = emb.reshape(B * S, D).astype(jnp.bfloat16)           # (B*S, D)
    return _fused_forward(emb2d, prep["w3d"], prep["bias_mask"],
                          prep["wh"], prep["bh"], prep["wo"], prep["bo"],
                          batch=B)


# ----------------------------------------------------------------------------
# Pure-JAX reference (PyTorch semantics). compute_dtype controls the precision
# of the matmul operands (f32 = exact module; bf16 = matches kernel math).
# ----------------------------------------------------------------------------
def reference_forward(inp, params, compute_dtype=jnp.float32):
    emb = params["emb_table"][inp]                               # (B, S, D)
    B, S, _ = emb.shape
    pools = []
    for w, b in zip(params["conv_ws"], params["conv_bs"]):
        f, _, C = w.shape
        L = S - f + 1
        sc = jnp.zeros((B, L, C), jnp.float32)
        for k in range(f):
            sc = sc + jnp.einsum(
                "bld,dc->blc",
                emb[:, k:k + L, :].astype(compute_dtype),
                w[k].astype(compute_dtype),
                preferred_element_type=jnp.float32)
        sc = sc + b[None, None, :]
        pools.append(jnp.max(jax.nn.relu(sc), axis=1))
    feat = jnp.concatenate(pools, axis=1)
    h = jnp.dot(feat.astype(compute_dtype), params["wh"].astype(compute_dtype),
                preferred_element_type=jnp.float32) + params["bh"]
    sig = jax.nn.sigmoid(h)
    hw = sig * jax.nn.relu(h) + (1.0 - sig) * feat
    return jnp.dot(hw.astype(compute_dtype), params["wo"].astype(compute_dtype),
                   preferred_element_type=jnp.float32) + params["bo"]


# ----------------------------------------------------------------------------
# Deterministic parameter construction (cfg.dis_init == 'uniform').
# ----------------------------------------------------------------------------
def init_params(key, vocab_size, embed_dim, filter_sizes, num_filters,
                padding_idx, out_dim):
    keys = jax.random.split(key, 3 + len(filter_sizes))
    feature_dim = sum(num_filters)

    emb_table = jax.random.uniform(
        keys[0], (vocab_size, embed_dim), jnp.float32, -0.05, 0.05)
    emb_table = emb_table.at[padding_idx].set(0.0)   # padding_idx row = 0

    conv_ws, conv_bs = [], []
    for i, (n, f) in enumerate(zip(num_filters, filter_sizes)):
        conv_ws.append(jax.random.uniform(
            keys[1 + i], (f, embed_dim, n), jnp.float32, -0.05, 0.05))
        conv_bs.append(jnp.zeros((n,), jnp.float32))

    wh = jax.random.uniform(
        keys[-2], (feature_dim, feature_dim), jnp.float32, -0.05, 0.05)
    bh = jnp.zeros((1, feature_dim), jnp.float32)
    wo = jax.random.uniform(
        keys[-1], (feature_dim, out_dim), jnp.float32, -0.05, 0.05)
    bo = jnp.zeros((1, out_dim), jnp.float32)

    return dict(emb_table=emb_table, conv_ws=conv_ws, conv_bs=conv_bs,
                wh=wh, bh=bh, wo=wo, bo=bo)


if __name__ == "__main__":
    # Small synthetic config (feature_dim = 128, embed_dim = 128 -> lane-dense).
    vocab_size = 64
    embed_dim = 128
    seq_len = 16
    batch = 32
    filter_sizes = (2, 3, 4)
    num_filters = (48, 40, 40)      # feature_dim = 128
    padding_idx = 0
    out_dim = 2                     # cfg.loss_mode == 'CrossEntropy'

    key = jax.random.PRNGKey(0)
    k_params, k_inp = jax.random.split(key)
    params = init_params(k_params, vocab_size, embed_dim, filter_sizes,
                         num_filters, padding_idx, out_dim)
    inp = jax.random.randint(k_inp, (batch, seq_len), 0, vocab_size,
                             dtype=jnp.int32)

    prep = prepare_params(params, seq_len, filter_sizes)
    pred = cnn_discriminator_forward(inp, prep)
    pred = jax.block_until_ready(pred)

    assert pred.shape == (batch, out_dim)
    # Tight check vs a reference that uses the same bf16 operand precision.
    ref_bf16 = reference_forward(inp, params, compute_dtype=jnp.bfloat16)
    assert jnp.allclose(pred, ref_bf16, atol=1e-4, rtol=1e-2), (pred, ref_bf16)
    # Loose check vs the exact f32 module semantics.
    ref_f32 = reference_forward(inp, params, compute_dtype=jnp.float32)
    assert jnp.allclose(pred, ref_f32, atol=2e-3, rtol=5e-2), (pred, ref_f32)

    print("KERNEL_OK")
</pallas_src>

<mosaic_0001>
module attributes {stable_mosaic.version = 11 : i64} {
  func.func @fused_disc_kernel(%arg0: i32, %arg1: memref<256x128xbf16, #tpu.memory_space<vmem>>, %arg2: memref<4x128x128xbf16, #tpu.memory_space<vmem>>, %arg3: memref<16x128xf32, #tpu.memory_space<vmem>>, %arg4: memref<128x128xbf16, #tpu.memory_space<vmem>>, %arg5: memref<1x128xf32, #tpu.memory_space<vmem>>, %arg6: memref<128x2xbf16, #tpu.memory_space<vmem>>, %arg7: memref<1x2xf32, #tpu.memory_space<vmem>>, %arg8: memref<16x2xf32, #tpu.memory_space<vmem>>, %arg9: memref<264x128xf32, #tpu.memory_space<vmem>>) attributes {dimension_semantics = [#tpu.dimension_semantics<parallel>], iteration_bounds = array<i64: 2>, scalar_prefetch = 0 : i64, scratch_operands = 1 : i64, tpu.core_type = #tpu.core_type<tc>, window_params = [{transform_indices = @transform_0, window_bounds = array<i64: 256, 128>}, {pipeline_mode = #tpu.pipeline_mode<synchronous>, transform_indices = @transform_1, window_bounds = array<i64: 4, 128, 128>}, {pipeline_mode = #tpu.pipeline_mode<synchronous>, transform_indices = @transform_2, window_bounds = array<i64: 16, 128>}, {pipeline_mode = #tpu.pipeline_mode<synchronous>, transform_indices = @transform_3, window_bounds = array<i64: 128, 128>}, {pipeline_mode = #tpu.pipeline_mode<synchronous>, transform_indices = @transform_4, window_bounds = array<i64: 1, 128>}, {pipeline_mode = #tpu.pipeline_mode<synchronous>, transform_indices = @transform_5, window_bounds = array<i64: 128, 2>}, {pipeline_mode = #tpu.pipeline_mode<synchronous>, transform_indices = @transform_6, window_bounds = array<i64: 1, 2>}, {transform_indices = @transform_7, window_bounds = array<i64: 16, 2>}]} {
    %c0 = arith.constant 0 : index
    %c0_0 = arith.constant 0 : index
    %0 = vector.load %arg1[%c0, %c0_0] : memref<256x128xbf16, #tpu.memory_space<vmem>>, vector<256x128xbf16>
    %1 = arith.extf %0 : vector<256x128xbf16> to vector<256x128xf32>
    %c0_1 = arith.constant 0 : index
    %c0_2 = arith.constant 0 : index
    %2 = vector.load %arg9[%c0_1, %c0_2] : memref<264x128xf32, #tpu.memory_space<vmem>>, vector<256x128xf32>
    tpu.vector_store %arg9[%c0_1, %c0_2], %1 {strides = array<i32>} : memref<264x128xf32, #tpu.memory_space<vmem>>, vector<256x128xf32>,
    %cst = arith.constant 0.000000e+00 : f32
    %3 = vector.broadcast %cst : f32 to vector<8x128xf32>
    %c256 = arith.constant 256 : index
    %c0_3 = arith.constant 0 : index
    %4 = vector.load %arg9[%c256, %c0_3] : memref<264x128xf32, #tpu.memory_space<vmem>>, vector<8x128xf32>
    tpu.vector_store %arg9[%c256, %c0_3], %3 {strides = array<i32>} : memref<264x128xf32, #tpu.memory_space<vmem>>, vector<8x128xf32>,
    %cst_4 = arith.constant 0.000000e+00 : f32
    %5 = vector.broadcast %cst_4 : f32 to vector<256x128xf32>
    %c0_5 = arith.constant 0 : index
    %c0_6 = arith.constant 0 : index
    %6 = vector.load %arg9[%c0_5, %c0_6] : memref<264x128xf32, #tpu.memory_space<vmem>>, vector<256x128xf32>
    %7 = arith.truncf %6 : vector<256x128xf32> to vector<256x128xbf16>
    %c0_7 = arith.constant 0 : index
    %c0_8 = arith.constant 0 : index
    %c0_9 = arith.constant 0 : index
    %8 = vector.load %arg2[%c0_7, %c0_8, %c0_9] : memref<4x128x128xbf16, #tpu.memory_space<vmem>>, vector<1x128x128xbf16>
    %9 = vector.shape_cast %8 : vector<1x128x128xbf16> to vector<128x128xbf16>
    %cst_10 = arith.constant dense<0.000000e+00> : vector<256x128xf32>
    %10 = tpu.matmul %7, %9, %cst_10 {dimension_numbers = #tpu.dot_dimension_numbers<[1], [0], [0], [1], [0, 0, 1, 1], [], []>} : vector<256x128xbf16>, vector<128x128xbf16>, vector<256x128xf32> -> vector<256x128xf32>
    %11 = arith.addf %5, %10 : vector<256x128xf32>
    %c1 = arith.constant 1 : index
    %c0_11 = arith.constant 0 : index
    %12 = vector.load %arg9[%c1, %c0_11] : memref<264x128xf32, #tpu.memory_space<vmem>>, vector<256x128xf32>
    %13 = arith.truncf %12 : vector<256x128xf32> to vector<256x128xbf16>
    %c1_12 = arith.constant 1 : index
    %c0_13 = arith.constant 0 : index
    %c0_14 = arith.constant 0 : index
    %14 = vector.load %arg2[%c1_12, %c0_13, %c0_14] : memref<4x128x128xbf16, #tpu.memory_space<vmem>>, vector<1x128x128xbf16>
    %15 = vector.shape_cast %14 : vector<1x128x128xbf16> to vector<128x128xbf16>
    %cst_15 = arith.constant dense<0.000000e+00> : vector<256x128xf32>
    %16 = tpu.matmul %13, %15, %cst_15 {dimension_numbers = #tpu.dot_dimension_numbers<[1], [0], [0], [1], [0, 0, 1, 1], [], []>} : vector<256x128xbf16>, vector<128x128xbf16>, vector<256x128xf32> -> vector<256x128xf32>
    %17 = arith.addf %11, %16 : vector<256x128xf32>
    %c2 = arith.constant 2 : index
    %c0_16 = arith.constant 0 : index
    %18 = vector.load %arg9[%c2, %c0_16] : memref<264x128xf32, #tpu.memory_space<vmem>>, vector<256x128xf32>
    %19 = arith.truncf %18 : vector<256x128xf32> to vector<256x128xbf16>
    %c2_17 = arith.constant 2 : index
    %c0_18 = arith.constant 0 : index
    %c0_19 = arith.constant 0 : index
    %20 = vector.load %arg2[%c2_17, %c0_18, %c0_19] : memref<4x128x128xbf16, #tpu.memory_space<vmem>>, vector<1x128x128xbf16>
    %21 = vector.shape_cast %20 : vector<1x128x128xbf16> to vector<128x128xbf16>
    %cst_20 = arith.constant dense<0.000000e+00> : vector<256x128xf32>
    %22 = tpu.matmul %19, %21, %cst_20 {dimension_numbers = #tpu.dot_dimension_numbers<[1], [0], [0], [1], [0, 0, 1, 1], [], []>} : vector<256x128xbf16>, vector<128x128xbf16>, vector<256x128xf32> -> vector<256x128xf32>
    %23 = arith.addf %17, %22 : vector<256x128xf32>
    %c3 = arith.constant 3 : index
    %c0_21 = arith.constant 0 : index
    %24 = vector.load %arg9[%c3, %c0_21] : memref<264x128xf32, #tpu.memory_space<vmem>>, vector<256x128xf32>
    %25 = arith.truncf %24 : vector<256x128xf32> to vector<256x128xbf16>
    %c3_22 = arith.constant 3 : index
    %c0_23 = arith.constant 0 : index
    %c0_24 = arith.constant 0 : index
    %26 = vector.load %arg2[%c3_22, %c0_23, %c0_24] : memref<4x128x128xbf16, #tpu.memory_space<vmem>>, vector<1x128x128xbf16>
    %27 = vector.shape_cast %26 : vector<1x128x128xbf16> to vector<128x128xbf16>
    %cst_25 = arith.constant dense<0.000000e+00> : vector<256x128xf32>
    %28 = tpu.matmul %25, %27, %cst_25 {dimension_numbers = #tpu.dot_dimension_numbers<[1], [0], [0], [1], [0, 0, 1, 1], [], []>} : vector<256x128xbf16>, vector<128x128xbf16>, vector<256x128xf32> -> vector<256x128xf32>
    %29 = arith.addf %23, %28 : vector<256x128xf32>
    %30 = vector.shape_cast %29 : vector<256x128xf32> to vector<16x16x128xf32>
    %c0_26 = arith.constant 0 : index
    %c0_27 = arith.constant 0 : index
    %31 = vector.load %arg3[%c0_26, %c0_27] : memref<16x128xf32, #tpu.memory_space<vmem>>, vector<16x128xf32>
    %32 = vector.shape_cast %31 : vector<16x128xf32> to vector<1x16x128xf32>
    %33 = vector.broadcast %32 : vector<1x16x128xf32> to vector<16x16x128xf32>
    %34 = arith.addf %30, %33 : vector<16x16x128xf32>
    %cst_28 = arith.constant 0.000000e+00 : f32
    %35 = vector.broadcast %cst_28 : f32 to vector<16x16x128xf32>
    %36 = arith.maximumf %34, %35 : vector<16x16x128xf32>
    %cst_29 = arith.constant dense<0xFF800000> : vector<16x128xf32>
    %37 = vector.multi_reduction <maximumf>, %36, %cst_29 [1] : vector<16x16x128xf32> to vector<16x128xf32>
    %38 = arith.truncf %37 : vector<16x128xf32> to vector<16x128xbf16>
    %c0_30 = arith.constant 0 : index
    %c0_31 = arith.constant 0 : index
    %39 = vector.load %arg4[%c0_30, %c0_31] : memref<128x128xbf16, #tpu.memory_space<vmem>>, vector<128x128xbf16>
    %cst_32 = arith.constant dense<0.000000e+00> : vector<16x128xf32>
    %40 = tpu.matmul %38, %39, %cst_32 {dimension_numbers = #tpu.dot_dimension_numbers<[1], [0], [0], [1], [0, 0, 1, 1], [], []>} : vector<16x128xbf16>, vector<128x128xbf16>, vector<16x128xf32> -> vector<16x128xf32>
    %c0_33 = arith.constant 0 : index
    %c0_34 = arith.constant 0 : index
    %41 = vector.load %arg5[%c0_33, %c0_34] : memref<1x128xf32, #tpu.memory_space<vmem>>, vector<1x128xf32>
    %42 = vector.broadcast %41 : vector<1x128xf32> to vector<16x128xf32>
    %43 = arith.addf %40, %42 : vector<16x128xf32>
    %cst_35 = arith.constant 0.000000e+00 : f32
    %44 = vector.broadcast %cst_35 : f32 to vector<16x128xf32>
    %45 = arith.subf %44, %43 : vector<16x128xf32>
    %46 = math.exp %45 : vector<16x128xf32>
    %cst_36 = arith.constant 1.000000e+00 : f32
    %47 = vector.broadcast %cst_36 : f32 to vector<16x128xf32>
    %48 = arith.addf %47, %46 : vector<16x128xf32>
    %49 = tpu.reciprocal %48 {approx = true} : vector<16x128xf32> -> vector<16x128xf32>
    %cst_37 = arith.constant 0.000000e+00 : f32
    %50 = vector.broadcast %cst_37 : f32 to vector<16x128xf32>
    %51 = arith.maximumf %43, %50 : vector<16x128xf32>
    %52 = arith.mulf %49, %51 : vector<16x128xf32>
    %cst_38 = arith.constant 1.000000e+00 : f32
    %53 = vector.broadcast %cst_38 : f32 to vector<16x128xf32>
    %54 = arith.subf %53, %49 : vector<16x128xf32>
    %55 = arith.mulf %54, %37 : vector<16x128xf32>
    %56 = arith.addf %52, %55 : vector<16x128xf32>
    %57 = arith.truncf %56 : vector<16x128xf32> to vector<16x128xbf16>
    %c0_39 = arith.constant 0 : index
    %c0_40 = arith.constant 0 : index
    %58 = vector.load %arg6[%c0_39, %c0_40] : memref<128x2xbf16, #tpu.memory_space<vmem>>, vector<128x2xbf16>
    %cst_41 = arith.constant dense<0.000000e+00> : vector<16x2xf32>
    %59 = tpu.matmul %57, %58, %cst_41 {dimension_numbers = #tpu.dot_dimension_numbers<[1], [0], [0], [1], [0, 0, 1, 1], [], []>} : vector<16x128xbf16>, vector<128x2xbf16>, vector<16x2xf32> -> vector<16x2xf32>
    %c0_42 = arith.constant 0 : index
    %c0_43 = arith.constant 0 : index
    %60 = vector.load %arg7[%c0_42, %c0_43] : memref<1x2xf32, #tpu.memory_space<vmem>>, vector<1x2xf32>
    %61 = vector.broadcast %60 : vector<1x2xf32> to vector<16x2xf32>
    %62 = arith.addf %59, %61 : vector<16x2xf32>
    %c0_44 = arith.constant 0 : index
    %c0_45 = arith.constant 0 : index
    %63 = vector.load %arg8[%c0_44, %c0_45] : memref<16x2xf32, #tpu.memory_space<vmem>>, vector<16x2xf32>
    tpu.vector_store %arg8[%c0_44, %c0_45], %62 {strides = array<i32>} : memref<16x2xf32, #tpu.memory_space<vmem>>, vector<16x2xf32>,
    return
  }
  func.func @transform_0(%arg0: i32) -> (i32, i32) {
    %c0_i32 = arith.constant 0 : i32
    %c0_i32_0 = arith.constant 0 : i32
    return %arg0, %c0_i32 : i32, i32
  }
  func.func @transform_1(%arg0: i32) -> (i32, i32, i32) {
    %c0_i32 = arith.constant 0 : i32
    %c0_i32_0 = arith.constant 0 : i32
    %c0_i32_1 = arith.constant 0 : i32
    %c0_i32_2 = arith.constant 0 : i32
    return %c0_i32, %c0_i32_0, %c0_i32_1 : i32, i32, i32
  }
  func.func @transform_2(%arg0: i32) -> (i32, i32) {
    %c0_i32 = arith.constant 0 : i32
    %c0_i32_0 = arith.constant 0 : i32
    %c0_i32_1 = arith.constant 0 : i32
    return %c0_i32, %c0_i32_0 : i32, i32
  }
  func.func @transform_3(%arg0: i32) -> (i32, i32) {
    %c0_i32 = arith.constant 0 : i32
    %c0_i32_0 = arith.constant 0 : i32
    %c0_i32_1 = arith.constant 0 : i32
    return %c0_i32, %c0_i32_0 : i32, i32
  }
  func.func @transform_4(%arg0: i32) -> (i32, i32) {
    %c0_i32 = arith.constant 0 : i32
    %c0_i32_0 = arith.constant 0 : i32
    %c0_i32_1 = arith.constant 0 : i32
    return %c0_i32, %c0_i32_0 : i32, i32
  }
  func.func @transform_5(%arg0: i32) -> (i32, i32) {
    %c0_i32 = arith.constant 0 : i32
    %c0_i32_0 = arith.constant 0 : i32
    %c0_i32_1 = arith.constant 0 : i32
    return %c0_i32, %c0_i32_0 : i32, i32
  }
  func.func @transform_6(%arg0: i32) -> (i32, i32) {
    %c0_i32 = arith.constant 0 : i32
    %c0_i32_0 = arith.constant 0 : i32
    %c0_i32_1 = arith.constant 0 : i32
    return %c0_i32, %c0_i32_0 : i32, i32
  }
  func.func @transform_7(%arg0: i32) -> (i32, i32) {
    %c0_i32 = arith.constant 0 : i32
    %c0_i32_0 = arith.constant 0 : i32
    return %arg0, %c0_i32 : i32, i32
  }
}

</mosaic_0001>

<bundles_post_ra>
// kernel: cnn_discriminator_forward.1
= control target key start
LH: loop header
LB: loop body
LE: loop exit
PB: predicated region body
PF: predicated region fallthrough
CT: control target
= control target key end

     0   :  { %s2791_s24 = smov 0   ;;  %s3225_s0 = inlined_call_operand.vmem [shape: bf16[512,128], index: 0, kind: input, shape index: {}]   ;;  %s3226_s1 = inlined_call_operand.vmem [shape: bf16[4,128,128], index: 1, kind: input, shape index: {}]   ;;  %s3227_s2 = inlined_call_operand.vmem [shape: f32[16,128], index: 2, kind: input, shape index: {}]   ;;  %s3228_s3 = inlined_call_operand.vmem [shape: bf16[128,128], index: 3, kind: input, shape index: {}]   ;;  %s3229_s4 = inlined_call_operand.vmem [shape: f32[1,128], index: 4, kind: input, shape index: {}]   ;;  %s3230_s5 = inlined_call_operand.vmem [shape: bf16[128,2], index: 5, kind: input, shape index: {}]   ;;  %s3231_s6 = inlined_call_operand.vmem [shape: f32[1,2], index: 6, kind: input, shape index: {}]   ;;  %s3232_s7 = inlined_call_operand.vmem [shape: f32[32,2], index: 7, kind: output, shape index: {}]  }
   0x1 LB: > { %s2124_s25 = sadd.s32 4294967295, %s2747_s24   ;;  %p2128_p0 = scmp.ge.s32.totalorder %s2747_s24, 1  ;;  %s2747_s24 = sphi %s2791_s24, %s17_s24  }
   0x2   : > { %p238_p1 = scmp.lt.s32.totalorder %s2747_s24, 3 }
   0x4   : > { %p239_p2 = pnand %p2128_p0, %p238_p1 }
   0x5   : > { %s2129_s28 = sshll.u32 (!%p239_p2), %s2124_s25, 5 }
   0x6   : > { %242 = sbr.rel (%p239_p2) target bundleno = 841 (0x349), region = 48  ;;  %p271_p3 = scmp.lt.s32.totalorder (!%p239_p2), %s2129_s28, 63 }
   0xb   : > { %v2668_v0 = vld [vmem:[%s3226_s1 + $0x78] sm:$0xff]   ;;  %v2670_v2 = vld [vmem:[%s3226_s1 + $0x70] sm:$0xff]   ;;  %v2749_v4 = vmov 0.0   ;;  %v2672_v5 = vld [vmem:[%s3226_s1 + $0x68] sm:$0xff]   ;;  %s3234_s28 = smov (!%p271_p3, %s2129_s28), 63  ;;  %vm2750_vm0 = vmmov 0  }
   0xc   : > { %v2669_v1 = vld [vmem:[%s3226_s1 + $0x38] sm:$0xff]   ;;  %2426 = vmatprep.subr.bf16.mxu0 %v2668_v0  ;;  %v2671_v3 = vld [vmem:[%s3226_s1 + $0x30] sm:$0xff]   ;;  %379 = vst [vmem:[#allocation2 + $0x100] sm:$0xff] %v2749_v4  ;;  %v2673_v6 = vld [vmem:[%s3226_s1 + $0x28] sm:$0xff]   ;;  %s2130_s20 = sshll.u32 %s3234_s28, 2  ;;  %vm1788_vm1 = vcmask 1041409  }
   0xd   : > { %2474 = vmatprep.subr.bf16.mxu1 %v2669_v1  ;;  %2427 = vmatpush3.bf16.msra.mxu0 %v2668_v0  ;;  %v2674_v7 = vld [vmem:[%s3226_s1 + $0x60] sm:$0xff]   ;;  %v2676_v9 = vld [vmem:[%s3226_s1 + $0x58] sm:$0xff]   ;;  %s2835_s30 = scalar_lea.vmem %s3225_s0, %s2130_s20  ;;  %v2678_v11 = vld [vmem:[%s3226_s1 + $0x50] sm:$0xff]   ;;  %vm1790_vm2 = vcmask 1042434   ;;  %vm1792_vm3 = vcmask 1043459   ;;  %vm1794_vm4 = vcmask 1044484  }
   0xe   : > { %2475 = vmatpush3.bf16.msra.mxu1 %v2669_v1  ;;  %2428 = vmatprep.subr.bf16.mxu0 %v2670_v2  ;;  %v2675_v8 = vld [vmem:[%s3226_s1 + $0x20] sm:$0xff]   ;;  %v2677_v10 = vld [vmem:[%s3226_s1 + $0x18] sm:$0xff]   ;;  %v2297_v13 = vld [vmem:[%s2835_s30 + $0x8] sm:$0xff]   ;;  %vm1796_vm5 = vcmask 1045509   ;;  %vm1798_vm6 = vcmask 1046534   ;;  %vm1800_vm7 = vcmask 1047559  }
   0xf   : > { %2476 = vmatprep.subr.bf16.mxu1 %v2671_v3  ;;  %v2234_v12 = vld [vmem:[%s2835_s30] sm:$0xff]   ;;  %v2679_v15 = vld [vmem:[%s3226_s1 + $0x10] sm:$0xff]   ;;  %v2239_v18 = vunpack.c.l.bf16 %v2297_v13  ;;  %v2240_v19 = vunpack.c.h.bf16 %v2297_v13  ;;  %v2299_v23 = vld [vmem:[%s2835_s30 + $0x18] sm:$0xff]   ;;  %s2131_s28 = sshll.u32 %s2124_s25, 1  ;;  %vm2065_vm8 = vcmask 15360  }
  0x10   : > { %v2684_v14 = vld [vmem:[%s2835_s30] sm:$0xff]  ;;  %v2235_v16 = vunpack.c.l.bf16 %v2234_v12  ;;  %v2236_v17 = vunpack.c.h.bf16 %v2234_v12  ;;  %v2298_v20 = vld [vmem:[%s2835_s30 + $0x10] sm:$0xff]   ;;  %v2680_v24 = vld [vmem:[%s3226_s1 + $0x48] sm:$0xff]   ;;  %v2247_v25 = vunpack.c.l.bf16 %v2299_v23  ;;  %v2248_v26 = vunpack.c.h.bf16 %v2299_v23  ;;  %p277_p4 = scmp.lt.s32.totalorder %s2131_s28, 3 }
  0x11   : > { %2429 = vmatpush3.bf16.msra.mxu0 %v2670_v2  ;;  %2490 = vmatprep.mubr.bf16.mxu1 %v2684_v14  ;;  %v2243_v21 = vunpack.c.l.bf16 %v2298_v20  ;;  %v2244_v22 = vunpack.c.h.bf16 %v2298_v20  ;;  %349 = vst [vmem:[#allocation2 + $0x10] sm:$0xff] %v2239_v18  ;;  %350 = vst [vmem:[#allocation2 + $0x18] sm:$0xff] %v2240_v19  ;;  %v2300_v27 = vld [vmem:[%s2835_s30 + $0x20] sm:$0xff]   ;;  %v2681_v28 = vld [vmem:[%s3226_s1 + $0x8] sm:$0xff]  }
  0x12   : > { %2477 = vmatpush3.bf16.msra.mxu1 %v2671_v3  ;;  %2430 = vmatprep.subr.bf16.mxu0 %v2672_v5  ;;  %347 = vst [vmem:[#allocation2] sm:$0xff] %v2235_v16  ;;  %348 = vst [vmem:[#allocation2 + $0x8] sm:$0xff] %v2236_v17  ;;  %v2251_v29 = vunpack.c.l.bf16 %v2300_v27  ;;  %v2252_v30 = vunpack.c.h.bf16 %v2300_v27  ;;  %v2301_v31 = vld [vmem:[%s2835_s30 + $0x28] sm:$0xff]   ;;  %v2302_v32 = vld [vmem:[%s2835_s30 + $0x30] sm:$0xff]   ;;  %s3236_s28 = smov (!%p277_p4, %s2131_s28), 3 }
  0x13   : > { %2478 = vmatprep.subr.bf16.mxu1 %v2673_v6  ;;  %351 = vst [vmem:[#allocation2 + $0x20] sm:$0xff] %v2243_v21  ;;  %352 = vst [vmem:[#allocation2 + $0x28] sm:$0xff] %v2244_v22  ;;  %v2682_v33 = vld [vmem:[%s3226_s1 + $0x40] sm:$0xff]   ;;  %v2255_v34 = vunpack.c.l.bf16 %v2301_v31  ;;  %v2256_v35 = vunpack.c.h.bf16 %v2301_v31  ;;  %v2259_v36 = vunpack.c.l.bf16 %v2302_v32  ;;  %v2260_v37 = vunpack.c.h.bf16 %v2302_v32  ;;  %v2686_v44 = vld [vmem:[%s3226_s1 + $0xb8] sm:$0xff]   ;;  %s2132_s8 = sshll.u32 %s3236_s28, 3 }
  0x14   : > { %353 = vst [vmem:[#allocation2 + $0x30] sm:$0xff] %v2247_v25  ;;  %354 = vst [vmem:[#allocation2 + $0x38] sm:$0xff] %v2248_v26  ;;  %v2683_v38 = vld [vmem:[%s3226_s1] sm:$0xff]   ;;  %v2303_v45 = vld [vmem:[%s2835_s30 + $0x38] sm:$0xff]   ;;  %s280_s12 = scalar_lea.vmem %s3232_s7, %s2132_s8 }
  0x15   : > { %2431 = vmatpush3.bf16.msra.mxu0 %v2672_v5  ;;  %355 = vst [vmem:[#allocation2 + $0x40] sm:$0xff] %v2251_v29  ;;  %356 = vst [vmem:[#allocation2 + $0x48] sm:$0xff] %v2252_v30  ;;  %v2304_v46 = vld [vmem:[%s2835_s30 + $0x40] sm:$0xff]   ;;  %v2687_v47 = vld [vmem:[%s3226_s1 + $0xf8] sm:$0xff]   ;;  %v2263_v50 = vunpack.c.l.bf16 %v2303_v45  ;;  %v2264_v51 = vunpack.c.h.bf16 %v2303_v45 }
  0x16   : > { %2479 = vmatpush3.bf16.msra.mxu1 %v2673_v6  ;;  %2432 = vmatprep.subr.bf16.mxu0 %v2674_v7  ;;  %357 = vst [vmem:[#allocation2 + $0x50] sm:$0xff] %v2255_v34  ;;  %358 = vst [vmem:[#allocation2 + $0x58] sm:$0xff] %v2256_v35  ;;  %v2267_v52 = vunpack.c.l.bf16 %v2304_v46  ;;  %v2268_v53 = vunpack.c.h.bf16 %v2304_v46  ;;  %v2685_v55 = vld [vmem:[%s2835_s30 + $0x8] sm:$0xff]  ;;  %v2688_v58 = vld [vmem:[%s2835_s30 + $0x10] sm:$0xff] }
  0x17   : > { %2480 = vmatprep.subr.bf16.mxu1 %v2675_v8  ;;  %359 = vst [vmem:[#allocation2 + $0x60] sm:$0xff] %v2259_v36  ;;  %360 = vst [vmem:[#allocation2 + $0x68] sm:$0xff] %v2260_v37  ;;  %v2305_v57 = vld [vmem:[%s2835_s30 + $0x48] sm:$0xff]   ;;  %v2690_v59 = vld [vmem:[%s3226_s1 + $0xb0] sm:$0xff]  }
  0x18   : > { %v446_v42 = vld [vmem:[#allocation2 + $0x11] sm:$0xff]  ;;  %361 = vst [vmem:[#allocation2 + $0x70] sm:$0xff] %v2263_v50  ;;  %362 = vst [vmem:[#allocation2 + $0x78] sm:$0xff] %v2264_v51  ;;  %v2271_v61 = vunpack.c.l.bf16 %v2305_v57  ;;  %v2272_v62 = vunpack.c.h.bf16 %v2305_v57  ;;  %v2694_v1 = vld [vmem:[%s3226_s1 + $0xa8] sm:$0xff]  }
  0x19   : > { %2433 = vmatpush3.bf16.msra.mxu0 %v2674_v7  ;;  %v444_v39 = vld [vmem:[#allocation2 + $0x1] sm:$0xff]  ;;  %v445_v40 = vld [vmem:[#allocation2 + $0x9] sm:$0xff]  ;;  %363 = vst [vmem:[#allocation2 + $0x80] sm:$0xff] %v2267_v52  ;;  %364 = vst [vmem:[#allocation2 + $0x88] sm:$0xff] %v2268_v53 }
  0x1a   : > { %2481 = vmatpush3.bf16.msra.mxu1 %v2675_v8  ;;  %2434 = vmatprep.subr.bf16.mxu0 %v2676_v9  ;;  %v476_v41 = vpack.c.bf16 %v445_v40, %v444_v39  ;;  %v447_v43 = vld [vmem:[#allocation2 + $0x19] sm:$0xff]  ;;  %v448_v48 = vld [vmem:[#allocation2 + $0x21] sm:$0xff]  ;;  %v2691_v60 = vld [vmem:[%s3226_s1 + $0xf0] sm:$0xff]   ;;  %365 = vst [vmem:[#allocation2 + $0x90] sm:$0xff] %v2271_v61 }
  0x1b   : > { %2482 = vmatprep.subr.bf16.mxu1 %v2677_v10  ;;  %v449_v49 = vld [vmem:[#allocation2 + $0x29] sm:$0xff]  ;;  %v477_v54 = vpack.c.bf16 %v447_v43, %v446_v42  ;;  %v450_v63 = vld [vmem:[#allocation2 + $0x31] sm:$0xff]  ;;  %366 = vst [vmem:[#allocation2 + $0x98] sm:$0xff] %v2272_v62  ;;  %v2692_v16 = vld [vmem:[%s2835_s30 + $0x20] sm:$0xff] }
  0x1c   : > { %2442 = vmatprep.mubr.bf16.mxu0 %v476_v41  ;;  %v478_v56 = vpack.c.bf16 %v449_v49, %v448_v48  ;;  %v451_v0 = vld [vmem:[#allocation2 + $0x39] sm:$0xff]  ;;  %v2306_v2 = vld [vmem:[%s2835_s30 + $0x50] sm:$0xff]   ;;  %v452_v3 = vld [vmem:[#allocation2 + $0x41] sm:$0xff] }
  0x1d   : > { %2435 = vmatpush3.bf16.msra.mxu0 %v2676_v9  ;;  %v2275_v5 = vunpack.c.l.bf16 %v2306_v2  ;;  %v2276_v6 = vunpack.c.h.bf16 %v2306_v2  ;;  %v453_v7 = vld [vmem:[#allocation2 + $0x49] sm:$0xff]  ;;  %v2307_v9 = vld [vmem:[%s2835_s30 + $0x58] sm:$0xff]   ;;  %v2698_v19 = vld [vmem:[%s3226_s1 + $0xa0] sm:$0xff]  }
  0x1e   : > { %2483 = vmatpush3.bf16.msra.mxu1 %v2677_v10  ;;  %2436 = vmatprep.subr.bf16.mxu0 %v2678_v11  ;;  %v2695_v8 = vld [vmem:[%s3226_s1 + $0xe8] sm:$0xff]   ;;  %v479_v10 = vpack.c.bf16 %v451_v0, %v450_v63  ;;  %v2280_v12 = vunpack.c.h.bf16 %v2307_v9  ;;  %v2689_v13 = vld [vmem:[%s2835_s30 + $0x18] sm:$0xff]  ;;  %v480_v14 = vpack.c.bf16 %v453_v7, %v452_v3  ;;  %v2699_v20 = vld [vmem:[%s3226_s1 + $0xe0] sm:$0xff]  }
  0x1f   : > { %2484 = vmatprep.subr.bf16.mxu1 %v2679_v15  ;;  %367 = vst [vmem:[#allocation2 + $0xa0] sm:$0xff] %v2275_v5  ;;  %368 = vst [vmem:[#allocation2 + $0xa8] sm:$0xff] %v2276_v6  ;;  %v2309_v21 = vld [vmem:[%s2835_s30 + $0x68] sm:$0xff]   ;;  %v454_v22 = vld [vmem:[#allocation2 + $0x51] sm:$0xff] }
  0x20   : > { %370 = vst [vmem:[#allocation2 + $0xb8] sm:$0xff] %v2280_v12  ;;  %v455_v23 = vld [vmem:[#allocation2 + $0x59] sm:$0xff]  ;;  %v2288_v25 = vunpack.c.h.bf16 %v2309_v21  ;;  %v2310_v26 = vld [vmem:[%s2835_s30 + $0x70] sm:$0xff]   ;;  %v456_v27 = vld [vmem:[#allocation2 + $0x61] sm:$0xff] }
  0x21   : > { %2437 = vmatpush3.bf16.msra.mxu0 %v2678_v11  ;;  %v2279_v11 = vunpack.c.l.bf16 %v2307_v9  ;;  %v2291_v29 = vunpack.c.l.bf16 %v2310_v26  ;;  %v2292_v30 = vunpack.c.h.bf16 %v2310_v26  ;;  %v2702_v31 = vld [vmem:[%s3226_s1 + $0x98] sm:$0xff]   ;;  %v481_v32 = vpack.c.bf16 %v455_v23, %v454_v22  ;;  %v2693_v35 = vld [vmem:[%s2835_s30 + $0x28] sm:$0xff]  ;;  %v2696_v39 = vld [vmem:[%s2835_s30 + $0x30] sm:$0xff] }
  0x22   : > { %2485 = vmatpush3.bf16.msra.mxu1 %v2679_v15  ;;  %2438 = vmatprep.subr.bf16.mxu0 %v2680_v24  ;;  %v2308_v15 = vld [vmem:[%s2835_s30 + $0x60] sm:$0xff]   ;;  %374 = vst [vmem:[#allocation2 + $0xd8] sm:$0xff] %v2288_v25  ;;  %v2311_v34 = vld [vmem:[%s2835_s30 + $0x78] sm:$0xff]   ;;  %v2706_v40 = vld [vmem:[%s3226_s1 + $0x90] sm:$0xff]  }
  0x23   : > { %2486 = vmatprep.subr.bf16.mxu1 %v2681_v28  ;;  %369 = vst [vmem:[#allocation2 + $0xb0] sm:$0xff] %v2279_v11  ;;  %v2283_v17 = vunpack.c.l.bf16 %v2308_v15  ;;  %v2284_v18 = vunpack.c.h.bf16 %v2308_v15  ;;  %375 = vst [vmem:[#allocation2 + $0xe0] sm:$0xff] %v2291_v29  ;;  %v2295_v37 = vunpack.c.l.bf16 %v2311_v34  ;;  %v2707_v41 = vld [vmem:[%s3226_s1 + $0xd0] sm:$0xff]   ;;  %v459_v43 = vld [vmem:[#allocation2 + $0x79] sm:$0xff] }
  0x24   : > { %376 = vst [vmem:[#allocation2 + $0xe8] sm:$0xff] %v2292_v30  ;;  %v458_v42 = vld [vmem:[#allocation2 + $0x71] sm:$0xff]  ;;  %v461_v45 = vld [vmem:[#allocation2 + $0x89] sm:$0xff]  ;;  %v2700_v51 = vld [vmem:[%s2835_s30 + $0x40] sm:$0xff] }
  0x25   : > { %2439 = vmatpush3.bf16.msra.mxu0 %v2680_v24  ;;  %371 = vst [vmem:[#allocation2 + $0xc0] sm:$0xff] %v2283_v17  ;;  %372 = vst [vmem:[#allocation2 + $0xc8] sm:$0xff] %v2284_v18  ;;  %v2287_v24 = vunpack.c.l.bf16 %v2309_v21  ;;  %v2710_v46 = vld [vmem:[%s3226_s1 + $0x88] sm:$0xff]   ;;  %v2697_v49 = vld [vmem:[%s2835_s30 + $0x38] sm:$0xff] }
  0x26   : > { %2487 = vmatpush3.bf16.msra.mxu1 %v2681_v28  ;;  %2440 = vmatprep.subr.bf16.mxu0 %v2682_v33  ;;  %v457_v28 = vld [vmem:[#allocation2 + $0x69] sm:$0xff]  ;;  %377 = vst [vmem:[#allocation2 + $0xf0] sm:$0xff] %v2295_v37  ;;  %v2714_v52 = vld [vmem:[%s3226_s1 + $0x80] sm:$0xff]   ;;  %v2705_v3 = vld [vmem:[%s2835_s30 + $0x58] sm:$0xff] }
  0x27   : > { %2488 = vmatprep.subr.bf16.mxu1 %v2683_v38  ;;  %373 = vst [vmem:[#allocation2 + $0xd0] sm:$0xff] %v2287_v24  ;;  %v482_v36 = vpack.c.bf16 %v457_v28, %v456_v27  ;;  %v2711_v48 = vld [vmem:[%s3226_s1 + $0xc8] sm:$0xff]   ;;  %v2715_v53 = vld [vmem:[%s3226_s1 + $0xc0] sm:$0xff]   ;;  %v2704_v61 = vld [vmem:[%s2835_s30 + $0x50] sm:$0xff] }
  0x28   : > { %v2708_v6 = vld [vmem:[%s2835_s30 + $0x60] sm:$0xff]  ;;  %v2709_v11 = vld [vmem:[%s2835_s30 + $0x68] sm:$0xff]  ;;  %v2713_v22 = vld [vmem:[%s2835_s30 + $0x78] sm:$0xff] }
  0x29   : > { %2441 = vmatpush3.bf16.msra.mxu0 %v2682_v33  ;;  %v2703_v33 = vld [vmem:[%s3226_s1 + $0xd8] sm:$0xff]   ;;  %v927_v17 = vld [vmem:[#allocation2 + $0x2] sm:$0xff]  ;;  %v928_v18 = vld [vmem:[#allocation2 + $0xa] sm:$0xff] }
  0x2a   : > { %2489 = vmatpush3.bf16.msra.mxu1 %v2683_v38  ;;  %2522 = vmatprep.subr.bf16.mxu0 %v2686_v44  ;;  %v2296_v38 = vunpack.c.h.bf16 %v2311_v34  ;;  %v465_v57 = vld [vmem:[#allocation2 + $0xa9] sm:$0xff]  ;;  %v466_v62 = vld [vmem:[#allocation2 + $0xb1] sm:$0xff]  ;;  %v959_v23 = vpack.c.bf16 %v928_v18, %v927_v17  ;;  %v930_v26 = vld [vmem:[#allocation2 + $0x1a] sm:$0xff] }
  0x2b   : > { %2570 = vmatprep.subr.bf16.mxu1 %v2687_v47  ;;  %v472_v9 = vld [vmem:[#allocation2 + $0xe1] sm:$0xff]  ;;  %v929_v25 = vld [vmem:[#allocation2 + $0x12] sm:$0xff]  ;;  %v932_v30 = vld [vmem:[#allocation2 + $0x2a] sm:$0xff] }
  0x2c   : > { %2443 = vmatmul.mubr.bf16.vlgmr.msra.gmra.mxu0 %v477_v54  ;;  %378 = vst [vmem:[#allocation2 + $0xf8] sm:$0xff] %v2296_v38  ;;  %v462_v54 = vld [vmem:[#allocation2 + $0x91] sm:$0xff]  ;;  %v467_v63 = vld [vmem:[#allocation2 + $0xb9] sm:$0xff]  ;;  %v468_v0 = vld [vmem:[#allocation2 + $0xc1] sm:$0xff] }
  0x2d   : > { %2491 = vmatmul.mubr.bf16.vlgmr.msra.gmra.mxu1 %v2685_v55  ;;  %2523 = vmatpush3.bf16.msra.mxu0 %v2686_v44  ;;  %v460_v44 = vld [vmem:[#allocation2 + $0x81] sm:$0xff]  ;;  %v463_v55 = vld [vmem:[#allocation2 + $0x99] sm:$0xff]  ;;  %v487_v2 = vpack.c.bf16 %v467_v63, %v466_v62  ;;  %v1254_v17 = vld [vmem:[#allocation2 + $0xab] sm:$0xff] }
  0x2e   : > { %2571 = vmatpush3.bf16.msra.mxu1 %v2687_v47  ;;  %2446 = vmatprep.mubr.bf16.mxu0 %v478_v56  ;;  %v483_v47 = vpack.c.bf16 %v459_v43, %v458_v42  ;;  %v484_v50 = vpack.c.bf16 %v461_v45, %v460_v44  ;;  %v464_v56 = vld [vmem:[#allocation2 + $0xa1] sm:$0xff]  ;;  %v470_v7 = vld [vmem:[#allocation2 + $0xd1] sm:$0xff] }
  0x2f   : > { %2494 = vmatprep.mubr.bf16.mxu1 %v2688_v58  ;;  %2524 = vmatprep.subr.bf16.mxu0 %v2690_v59  ;;  %v485_v58 = vpack.c.bf16 %v463_v55, %v462_v54  ;;  %v1235_v27 = vld [vmem:[#allocation2 + $0x13] sm:$0xff]  ;;  %v1236_v28 = vld [vmem:[#allocation2 + $0x1b] sm:$0xff]  ;;  %v936_v42 = vld [vmem:[#allocation2 + $0x4a] sm:$0xff] }
  0x30   : > { %2572 = vmatprep.subr.bf16.mxu1 %v2691_v60  ;;  %v931_v29 = vld [vmem:[#allocation2 + $0x22] sm:$0xff]  ;;  %v1266_v34 = vpack.c.bf16 %v1236_v28, %v1235_v27  ;;  %v933_v37 = vld [vmem:[#allocation2 + $0x32] sm:$0xff]  ;;  %v934_v38 = vld [vmem:[#allocation2 + $0x3a] sm:$0xff] }
  0x31   : > { %2525 = vmatpush3.bf16.msra.mxu0 %v2690_v59  ;;  %v2701_v59 = vld [vmem:[%s2835_s30 + $0x48] sm:$0xff]  ;;  %v962_v45 = vpack.c.bf16 %v934_v38, %v933_v37  ;;  %v942_v62 = vld [vmem:[#allocation2 + $0x7a] sm:$0xff] }
  0x32   : > { %2573 = vmatpush3.bf16.msra.mxu1 %v2691_v60  ;;  %2526 = vmatprep.subr.bf16.mxu0 %v2694_v1  ;;  %v486_v60 = vpack.c.bf16 %v465_v57, %v464_v56  ;;  %v1241_v43 = vld [vmem:[#allocation2 + $0x43] sm:$0xff]  ;;  %v1242_v44 = vld [vmem:[#allocation2 + $0x4b] sm:$0xff]  ;;  %v1247_v63 = vld [vmem:[#allocation2 + $0x73] sm:$0xff] }
  0x33   : > { %2574 = vmatprep.subr.bf16.mxu1 %v2695_v8  ;;  %v474_v15 = vld [vmem:[#allocation2 + $0xf1] sm:$0xff]  ;;  %v1245_v55 = vld [vmem:[#allocation2 + $0x63] sm:$0xff]  ;;  %v1260_v37 = vld [vmem:[#allocation2 + $0xdb] sm:$0xff] }
  0x34   : > { %2447 = vmatmul.mubr.bf16.gmra.mxu0 %v479_v10  ;;  %v473_v10 = vld [vmem:[#allocation2 + $0xe9] sm:$0xff] }
  0x35   : > { %2495 = vmatmul.mubr.bf16.gmra.mxu1 %v2689_v13  ;;  %2450 = vmatprep.mubr.bf16.mxu0 %v480_v14  ;;  %v2712_v13 = vld [vmem:[%s2835_s30 + $0x70] sm:$0xff]  ;;  %v490_v14 = vpack.c.bf16 %v473_v10, %v472_v9  ;;  %v1257_v28 = vld [vmem:[#allocation2 + $0xc3] sm:$0xff] }
  0x36   : > { %2498 = vmatprep.mubr.bf16.mxu1 %v2692_v16  ;;  %2527 = vmatpush3.bf16.msra.mxu0 %v2694_v1  ;;  %v469_v1 = vld [vmem:[#allocation2 + $0xc9] sm:$0xff]  ;;  %v475_v16 = vld [vmem:[#allocation2 + $0xf9] sm:$0xff] }
  0x37   : > { %2575 = vmatpush3.bf16.msra.mxu1 %v2695_v8  ;;  %2528 = vmatprep.subr.bf16.mxu0 %v2698_v19  ;;  %v488_v5 = vpack.c.bf16 %v469_v1, %v468_v0  ;;  %v471_v8 = vld [vmem:[#allocation2 + $0xd9] sm:$0xff]  ;;  %v491_v21 = vpack.c.bf16 %v475_v16, %v474_v15  ;;  %v940_v54 = vld [vmem:[#allocation2 + $0x6a] sm:$0xff]  ;;  %v943_v1 = vld [vmem:[#allocation2 + $0x82] sm:$0xff] }
  0x38   : > { %2576 = vmatprep.subr.bf16.mxu1 %v2699_v20  ;;  %v489_v12 = vpack.c.bf16 %v471_v8, %v470_v7  ;;  %v1246_v56 = vld [vmem:[#allocation2 + $0x6b] sm:$0xff]  ;;  %v1248_v0 = vld [vmem:[#allocation2 + $0x7b] sm:$0xff]  ;;  %v1253_v16 = vld [vmem:[#allocation2 + $0xa3] sm:$0xff] }
  0x39   : > { %v1272_v7 = vpack.c.bf16 %v1248_v0, %v1247_v63  ;;  %v945_v10 = vld [vmem:[#allocation2 + $0x92] sm:$0xff]  ;;  %v948_v15 = vld [vmem:[#allocation2 + $0xaa] sm:$0xff]  ;;  %v955_v38 = vld [vmem:[#allocation2 + $0xe2] sm:$0xff] }
  0x3a   : > { %2529 = vmatpush3.bf16.msra.mxu0 %v2698_v19  ;;  %v1233_v19 = vld [vmem:[#allocation2 + $0x3] sm:$0xff] }
  0x3b   : > { %2577 = vmatpush3.bf16.msra.mxu1 %v2699_v20  ;;  %2530 = vmatprep.subr.bf16.mxu0 %v2702_v31  ;;  %v1234_v20 = vld [vmem:[#allocation2 + $0xb] sm:$0xff] }
  0x3c   : > { %2451 = vmatmul.mubr.bf16.gmra.mxu0 %v481_v32  ;;  %2578 = vmatprep.subr.bf16.mxu1 %v2703_v33  ;;  %v1265_v24 = vpack.c.bf16 %v1234_v20, %v1233_v19  ;;  %v1238_v32 = vld [vmem:[#allocation2 + $0x2b] sm:$0xff] }
  0x3d   : > { %2499 = vmatmul.mubr.bf16.gmra.mxu1 %v2693_v35  ;;  %2454 = vmatprep.mubr.bf16.mxu0 %v482_v36  ;;  %v961_v35 = vpack.c.bf16 %v932_v30, %v931_v29  ;;  %v952_v27 = vld [vmem:[#allocation2 + $0xca] sm:$0xff] }
  0x3e   : > { %2502 = vmatprep.mubr.bf16.mxu1 %v2696_v39  ;;  %2531 = vmatpush3.bf16.msra.mxu0 %v2702_v31  ;;  %v1237_v31 = vld [vmem:[#allocation2 + $0x23] sm:$0xff]  ;;  %v1239_v39 = vld [vmem:[#allocation2 + $0x33] sm:$0xff]  ;;  %v1258_v29 = vld [vmem:[#allocation2 + $0xcb] sm:$0xff] }
  0x3f   : > { %2579 = vmatpush3.bf16.msra.mxu1 %v2703_v33  ;;  %2532 = vmatprep.subr.bf16.mxu0 %v2706_v40  ;;  %v960_v33 = vpack.c.bf16 %v930_v26, %v929_v25  ;;  %v1267_v36 = vpack.c.bf16 %v1238_v32, %v1237_v31  ;;  %v1256_v25 = vld [vmem:[#allocation2 + $0xbb] sm:$0xff] }
  0x40   : > { %2580 = vmatprep.subr.bf16.mxu1 %v2707_v41  ;;  %v951_v26 = vld [vmem:[#allocation2 + $0xc2] sm:$0xff] }
  0x41   : > { %v971_v32 = vpack.c.bf16 %v952_v27, %v951_v26 }
  0x42   : > { %2533 = vmatpush3.bf16.msra.mxu0 %v2706_v40  ;;  %v1240_v40 = vld [vmem:[#allocation2 + $0x3b] sm:$0xff] }
  0x43   : > { %2581 = vmatpush3.bf16.msra.mxu1 %v2707_v41  ;;  %2534 = vmatprep.subr.bf16.mxu0 %v2710_v46  ;;  %v935_v41 = vld [vmem:[#allocation2 + $0x42] sm:$0xff] }
  0x44   : > { %2455 = vmatmul.mubr.bf16.gmra.mxu0 %v483_v47  ;;  %2582 = vmatprep.subr.bf16.mxu1 %v2711_v48  ;;  %v963_v47 = vpack.c.bf16 %v936_v42, %v935_v41  ;;  %v1262_v41 = vld [vmem:[#allocation2 + $0xeb] sm:$0xff] }
  0x45   : > { %2503 = vmatmul.mubr.bf16.gmra.mxu1 %v2697_v49  ;;  %2458 = vmatprep.mubr.bf16.mxu0 %v484_v50  ;;  %v937_v49 = vld [vmem:[#allocation2 + $0x52] sm:$0xff]  ;;  %v938_v50 = vld [vmem:[#allocation2 + $0x5a] sm:$0xff] }
  0x46   : > { %2506 = vmatprep.mubr.bf16.mxu1 %v2700_v51  ;;  %2535 = vmatpush3.bf16.msra.mxu0 %v2710_v46  ;;  %v1268_v46 = vpack.c.bf16 %v1240_v40, %v1239_v39  ;;  %v1243_v51 = vld [vmem:[#allocation2 + $0x53] sm:$0xff]  ;;  %v964_v57 = vpack.c.bf16 %v938_v50, %v937_v49  ;;  %v956_v39 = vld [vmem:[#allocation2 + $0xea] sm:$0xff]  ;;  %v1264_v49 = vld [vmem:[#allocation2 + $0xfb] sm:$0xff] }
  0x47   : > { %2583 = vmatpush3.bf16.msra.mxu1 %v2711_v48  ;;  %2536 = vmatprep.subr.bf16.mxu0 %v2714_v52  ;;  %v1269_v48 = vpack.c.bf16 %v1242_v44, %v1241_v43  ;;  %v1261_v40 = vld [vmem:[#allocation2 + $0xe3] sm:$0xff]  ;;  %v973_v44 = vpack.c.bf16 %v956_v39, %v955_v38 }
  0x48   : > { %2584 = vmatprep.subr.bf16.mxu1 %v2715_v53 }
  0x4a   : > { %2537 = vmatpush3.bf16.msra.mxu0 %v2714_v52  ;;  %v1244_v52 = vld [vmem:[#allocation2 + $0x5b] sm:$0xff] }
  0x4b   : > { %2585 = vmatpush3.bf16.msra.mxu1 %v2715_v53  ;;  %2618 = vmatprep.subr.bf16.mxu0 %v2749_v4  ;;  %v939_v53 = vld [vmem:[#allocation2 + $0x62] sm:$0xff] }
  0x4c   : > { %2459 = vmatmul.mubr.bf16.gmra.mxu0 %v485_v58  ;;  %2638 = vmatprep.subr.bf16.mxu1 %v2749_v4  ;;  %v1270_v58 = vpack.c.bf16 %v1244_v52, %v1243_v51  ;;  %v2716_v52 = vld [vmem:[%s3228_s3 + $0x38] sm:$0xff]  }
  0x4d   : > { %2507 = vmatmul.mubr.bf16.gmra.mxu1 %v2701_v59  ;;  %2462 = vmatprep.mubr.bf16.mxu0 %v486_v60  ;;  %v965_v59 = vpack.c.bf16 %v940_v54, %v939_v53  ;;  %v1271_v60 = vpack.c.bf16 %v1246_v56, %v1245_v55 }
  0x4e   : > { %2510 = vmatprep.mubr.bf16.mxu1 %v2704_v61  ;;  %v941_v61 = vld [vmem:[#allocation2 + $0x72] sm:$0xff] }
  0x54   : > { %2463 = vmatmul.mubr.bf16.gmra.mxu0 %v487_v2  ;;  %v944_v2 = vld [vmem:[#allocation2 + $0x8a] sm:$0xff] }
  0x55   : > { %2511 = vmatmul.mubr.bf16.gmra.mxu1 %v2705_v3  ;;  %2466 = vmatprep.mubr.bf16.mxu0 %v488_v5  ;;  %v1249_v3 = vld [vmem:[#allocation2 + $0x83] sm:$0xff]  ;;  %v1250_v5 = vld [vmem:[#allocation2 + $0x8b] sm:$0xff]  ;;  %v967_v8 = vpack.c.bf16 %v944_v2, %v943_v1 }
  0x56   : > { %2514 = vmatprep.mubr.bf16.mxu1 %v2708_v6  ;;  %v966_v6 = vpack.c.bf16 %v942_v62, %v941_v61  ;;  %v1273_v9 = vpack.c.bf16 %v1250_v5, %v1249_v3  ;;  %v2717_v61 = vld [vmem:[%s3228_s3 + $0x30] sm:$0xff]  }
  0x5c   : > { %2467 = vmatmul.mubr.bf16.gmra.mxu0 %v489_v12  ;;  %v1251_v12 = vld [vmem:[#allocation2 + $0x93] sm:$0xff] }
  0x5d   : > { %2515 = vmatmul.mubr.bf16.gmra.mxu1 %v2709_v11  ;;  %2470 = vmatprep.mubr.bf16.mxu0 %v490_v14  ;;  %v946_v11 = vld [vmem:[#allocation2 + $0x9a] sm:$0xff]  ;;  %v947_v14 = vld [vmem:[#allocation2 + $0xa2] sm:$0xff] }
  0x5e   : > { %2518 = vmatprep.mubr.bf16.mxu1 %v2712_v13  ;;  %v1252_v13 = vld [vmem:[#allocation2 + $0x9b] sm:$0xff]  ;;  %v968_v18 = vpack.c.bf16 %v946_v11, %v945_v10  ;;  %v969_v20 = vpack.c.bf16 %v948_v15, %v947_v14 }
  0x5f   : > { %v1274_v19 = vpack.c.bf16 %v1252_v13, %v1251_v12  ;;  %v2960_v12 = vld [vmem:[#allocation2 + $0x100] sm:$0xff] }
  0x60   : > { %v2719_v14 = vld [vmem:[%s3228_s3 + $0x20] sm:$0xff]  }
  0x64   : > { %2471 = vmatmul.mubr.bf16.gmra.mxu0 %v491_v21  ;;  %v1275_v21 = vpack.c.bf16 %v1254_v17, %v1253_v16 }
  0x65   : > { %2519 = vmatmul.mubr.bf16.gmra.mxu1 %v2713_v22  ;;  %2538 = vmatprep.mubr.bf16.mxu0 %v959_v23  ;;  %v949_v22 = vld [vmem:[#allocation2 + $0xb2] sm:$0xff]  ;;  %v950_v23 = vld [vmem:[#allocation2 + $0xba] sm:$0xff] }
  0x66   : > { %2586 = vmatprep.mubr.bf16.mxu1 %v1265_v24  ;;  %v1255_v24 = vld [vmem:[#allocation2 + $0xb3] sm:$0xff]  ;;  %v970_v30 = vpack.c.bf16 %v950_v23, %v949_v22 }
  0x67   : > { %v1276_v31 = vpack.c.bf16 %v1256_v25, %v1255_v24  ;;  %v2720_v22 = vld [vmem:[%s3228_s3 + $0x18] sm:$0xff]  }
  0x6c   : > { %2539 = vmatmul.mubr.bf16.vlgmr.msra.gmra.mxu0 %v960_v33  ;;  %v1277_v33 = vpack.c.bf16 %v1258_v29, %v1257_v28  ;;  %v2721_v29 = vld [vmem:[%s3228_s3 + $0x10] sm:$0xff]  }
  0x6d   : > { %2587 = vmatmul.mubr.bf16.vlgmr.msra.gmra.mxu1 %v1266_v34  ;;  %2542 = vmatprep.mubr.bf16.mxu0 %v961_v35  ;;  %v953_v34 = vld [vmem:[#allocation2 + $0xd2] sm:$0xff]  ;;  %v954_v35 = vld [vmem:[#allocation2 + $0xda] sm:$0xff] }
  0x6e   : > { %2590 = vmatprep.mubr.bf16.mxu1 %v1267_v36  ;;  %v1259_v36 = vld [vmem:[#allocation2 + $0xd3] sm:$0xff]  ;;  %v972_v42 = vpack.c.bf16 %v954_v35, %v953_v34  ;;  %2619 = vmatpush3.bf16.msra.mxu0 %v2716_v52 }
  0x6f   : > { %v1278_v43 = vpack.c.bf16 %v1260_v37, %v1259_v36  ;;  %2620 = vmatprep.subr.bf16.mxu0 %v2749_v4  ;;  %v2722_v36 = vld [vmem:[%s3228_s3 + $0x8] sm:$0xff]   ;;  %v2724_v52 = vld [vmem:[%s3230_s5 + $0x38] sm:$0xff]  }
  0x70   : > { %2639 = vmatpush3.bf16.msra.mxu1 %v2724_v52 }
  0x71   : > { %2640 = vmatprep.subr.bf16.mxu1 %v2960_v12 }
  0x72   : > { %2621 = vmatpush3.bf16.msra.mxu0 %v2717_v61 }
  0x73   : > { %2622 = vmatprep.subr.bf16.mxu0 %v2749_v4 }
  0x74   : > { %2543 = vmatmul.mubr.bf16.gmra.mxu0 %v962_v45  ;;  %v1279_v45 = vpack.c.bf16 %v1262_v41, %v1261_v40 }
  0x75   : > { %2591 = vmatmul.mubr.bf16.gmra.mxu1 %v1268_v46  ;;  %2546 = vmatprep.mubr.bf16.mxu0 %v963_v47  ;;  %v957_v46 = vld [vmem:[#allocation2 + $0xf2] sm:$0xff]  ;;  %v958_v47 = vld [vmem:[#allocation2 + $0xfa] sm:$0xff] }
  0x76   : > { %2594 = vmatprep.mubr.bf16.mxu1 %v1269_v48  ;;  %v1263_v48 = vld [vmem:[#allocation2 + $0xf3] sm:$0xff]  ;;  %v974_v50 = vpack.c.bf16 %v958_v47, %v957_v46 }
  0x77   : > { %v1280_v51 = vpack.c.bf16 %v1264_v49, %v1263_v48 }
  0x7c   : > { %2547 = vmatmul.mubr.bf16.gmra.mxu0 %v964_v57 }
  0x7d   : > { %2595 = vmatmul.mubr.bf16.gmra.mxu1 %v1270_v58  ;;  %2550 = vmatprep.mubr.bf16.mxu0 %v965_v59 }
  0x7e   : > { %2598 = vmatprep.mubr.bf16.mxu1 %v1271_v60 }
  0x84   : > { %2551 = vmatmul.mubr.bf16.gmra.mxu0 %v966_v6 }
  0x85   : > { %2599 = vmatmul.mubr.bf16.gmra.mxu1 %v1272_v7  ;;  %2554 = vmatprep.mubr.bf16.mxu0 %v967_v8  ;;  %v2718_v7 = vld [vmem:[%s3228_s3 + $0x28] sm:$0xff]  }
  0x86   : > { %2602 = vmatprep.mubr.bf16.mxu1 %v1273_v9  ;;  %2623 = vmatpush3.bf16.msra.mxu0 %v2718_v7 }
  0x87   : > { %2624 = vmatprep.subr.bf16.mxu0 %v2960_v12 }
  0x8a   : > { %2625 = vmatpush3.bf16.msra.mxu0 %v2719_v14 }
  0x8b   : > { %2626 = vmatprep.subr.bf16.mxu0 %v2960_v12 }
  0x8c   : > { %2555 = vmatmul.mubr.bf16.gmra.mxu0 %v968_v18 }
  0x8d   : > { %2603 = vmatmul.mubr.bf16.gmra.mxu1 %v1274_v19  ;;  %2558 = vmatprep.mubr.bf16.mxu0 %v969_v20 }
  0x8e   : > { %2606 = vmatprep.mubr.bf16.mxu1 %v1275_v21  ;;  %2627 = vmatpush3.bf16.msra.mxu0 %v2720_v22 }
  0x8f   : > { %2628 = vmatprep.subr.bf16.mxu0 %v2960_v12 }
  0x92   : > { %2629 = vmatpush3.bf16.msra.mxu0 %v2721_v29 }
  0x93   : > { %2630 = vmatprep.subr.bf16.mxu0 %v2960_v12 }
  0x94   : > { %2559 = vmatmul.mubr.bf16.gmra.mxu0 %v970_v30 }
  0x95   : > { %2607 = vmatmul.mubr.bf16.gmra.mxu1 %v1276_v31  ;;  %2562 = vmatprep.mubr.bf16.mxu0 %v971_v32 }
  0x96   : > { %2610 = vmatprep.mubr.bf16.mxu1 %v1277_v33  ;;  %2631 = vmatpush3.bf16.msra.mxu0 %v2722_v36 }
  0x97   : > { %2632 = vmatprep.subr.bf16.mxu0 %v2960_v12 }
  0x9c   : > { %2563 = vmatmul.mubr.bf16.gmra.mxu0 %v972_v42  ;;  %v2723_v42 = vld [vmem:[%s3228_s3] sm:$0xff]  }
  0x9d   : > { %2611 = vmatmul.mubr.bf16.gmra.mxu1 %v1278_v43  ;;  %2566 = vmatprep.mubr.bf16.mxu0 %v973_v44 }
  0x9e   : > { %2614 = vmatprep.mubr.bf16.mxu1 %v1279_v45  ;;  %2633 = vmatpush3.bf16.msra.mxu0 %v2723_v42 }
  0xa4   : > { %2567 = vmatmul.mubr.bf16.gmra.mxu0 %v974_v50 }
  0xa5   : > { %2615 = vmatmul.mubr.bf16.gmra.mxu1 %v1280_v51  ;;  %2634 = vmatprep.mubr.msk.bf16.mxu0 %vm2750_vm0, %v2960_v12 }
  0xa6   : > { %2654 = vmatprep.mubr.msk.bf16.mxu1 %vm2750_vm0, %v2960_v12 }
  0xec   : > { %v2444_v53 = vpop.f32.mrf.mxu0 }
  0xed   : > { %v2492_v54 = vpop.f32.mrf.mxu1 }
  0xee   : > { %v2941_v55 = vadd.f32 %v2492_v54, %v2444_v53  ;;  %v591_v56 = vpop.f32.mrf.mxu0 }
  0xef   : > { %v800_v57 = vpop.f32.mrf.mxu1 }
  0xf0   : > { %v2943_v58 = vadd.f32 %v800_v57, %v591_v56  ;;  %v2445_v59 = vpop.f32.mrf.mxu0  ;;  %v2725_v57 = vld [vmem:[%s3230_s5 + $0x30] sm:$0xff]  }
  0xf1   : > { %v2493_v60 = vpop.f32.mrf.mxu1  ;;  %2641 = vmatpush3.bf16.msra.mxu1 %v2725_v57  ;;  %v3053_v57 = vld [vmem:[%s3227_s2] sm:$0xff] }
  0xf2   : > { %v2948_v62 = vadd.f32 %v2493_v60, %v2445_v59  ;;  %v594_v63 = vpop.f32.mrf.mxu0  ;;  %2642 = vmatprep.subr.bf16.mxu1 %v2960_v12 }
  0xf3   : > { %v803_v0 = vpop.f32.mrf.mxu1 }
  0xf4   : > { %v2950_v1 = vadd.f32 %v803_v0, %v594_v63  ;;  %v2448_v2 = vpop.f32.mrf.mxu0 }
  0xf5   : > { %v2496_v3 = vpop.f32.mrf.mxu1 }
  0xf6   : > { %v2953_v5 = vadd.f32 %v2496_v3, %v2448_v2  ;;  %v607_v6 = vpop.f32.mrf.mxu0 }
  0xf7   : > { %v816_v8 = vpop.f32.mrf.mxu1 }
  0xf8   : > { %v2958_v9 = vadd.f32 %v816_v8, %v607_v6  ;;  %v2449_v10 = vpop.f32.mrf.mxu0 }
  0xf9   : > { %v2497_v11 = vpop.f32.mrf.mxu1 }
  0xfa   : > { %v2963_v13 = vadd.f32 %v2497_v11, %v2449_v10  ;;  %v610_v4 = vpop.f32.mrf.mxu0 }
  0xfb   : > { %v819_v15 = vpop.f32.mrf.mxu1 }
  0xfc   : > { %v2968_v16 = vadd.f32 %v819_v15, %v610_v4  ;;  %v2452_v17 = vpop.f32.mrf.mxu0 }
  0xfd   : > { %v2500_v18 = vpop.f32.mrf.mxu1 }
  0xfe   : > { %v2971_v19 = vadd.f32 %v2500_v18, %v2452_v17  ;;  %v623_v20 = vpop.f32.mrf.mxu0 }
  0xff   : > { %v832_v21 = vpop.f32.mrf.mxu1 }
 0x100   : > { %v2976_v23 = vadd.f32 %v832_v21, %v623_v20  ;;  %v2453_v24 = vpop.f32.mrf.mxu0 }
 0x101   : > { %v2501_v25 = vpop.f32.mrf.mxu1 }
 0x102   : > { %v2978_v26 = vadd.f32 %v2501_v25, %v2453_v24  ;;  %v626_v27 = vpop.f32.mrf.mxu0 }
 0x103   : > { %v835_v28 = vpop.f32.mrf.mxu1 }
 0x104   : > { %v2984_v30 = vadd.f32 %v835_v28, %v626_v27  ;;  %v2456_v31 = vpop.f32.mrf.mxu0 }
 0x105   : > { %v2504_v32 = vpop.f32.mrf.mxu1 }
 0x106   : > { %v2986_v33 = vadd.f32 %v2504_v32, %v2456_v31  ;;  %v639_v34 = vpop.f32.mrf.mxu0 }
 0x107   : > { %v848_v35 = vpop.f32.mrf.mxu1 }
 0x108   : > { %v2992_v37 = vadd.f32 %v848_v35, %v639_v34  ;;  %v2457_v38 = vpop.f32.mrf.mxu0 }
 0x109   : > { %v2505_v39 = vpop.f32.mrf.mxu1 }
 0x10a   : > { %v2994_v40 = vadd.f32 %v2505_v39, %v2457_v38  ;;  %v642_v41 = vpop.f32.mrf.mxu0 }
 0x10b   : > { %v851_v43 = vpop.f32.mrf.mxu1 }
 0x10c   : > { %v3002_v44 = vadd.f32 %v851_v43, %v642_v41  ;;  %v2460_v45 = vpop.f32.mrf.mxu0 }
 0x10d   : > { %v2508_v46 = vpop.f32.mrf.mxu1 }
 0x10e   : > { %v3004_v47 = vadd.f32 %v2508_v46, %v2460_v45  ;;  %v655_v48 = vpop.f32.mrf.mxu0 }
 0x10f   : > { %v864_v49 = vpop.f32.mrf.mxu1 }
 0x110   : > { %v3006_v50 = vadd.f32 %v864_v49, %v655_v48  ;;  %v2461_v51 = vpop.f32.mrf.mxu0 }
 0x111   : > { %v2509_v53 = vpop.f32.mrf.mxu1 }
 0x112   : > { %v3011_v54 = vadd.f32 %v2509_v53, %v2461_v51  ;;  %v658_v56 = vpop.f32.mrf.mxu0 }
 0x113   : > { %v867_v59 = vpop.f32.mrf.mxu1 }
 0x114   : > { %v3017_v60 = vadd.f32 %v867_v59, %v658_v56  ;;  %v2464_v61 = vpop.f32.mrf.mxu0 }
 0x115   : > { %v2512_v63 = vpop.f32.mrf.mxu1 }
 0x116   : > { %v3019_v0 = vadd.f32 %v2512_v63, %v2464_v61  ;;  %v671_v2 = vpop.f32.mrf.mxu0 }
 0x117   : > { %v880_v3 = vpop.f32.mrf.mxu1 }
 0x118   : > { %v3022_v6 = vadd.f32 %v880_v3, %v671_v2  ;;  %v2465_v7 = vpop.f32.mrf.mxu0 }
 0x119   : > { %v2513_v8 = vpop.f32.mrf.mxu1 }
 0x11a   : > { %v3024_v10 = vadd.f32 %v2513_v8, %v2465_v7  ;;  %v674_v11 = vpop.f32.mrf.mxu0 }
 0x11b   : > { %v883_v4 = vpop.f32.mrf.mxu1 }
 0x11c   : > { %v3026_v14 = vadd.f32 %v883_v4, %v674_v11  ;;  %v2468_v15 = vpop.f32.mrf.mxu0 }
 0x11d   : > { %v2516_v17 = vpop.f32.mrf.mxu1 }
 0x11e   : > { %v3028_v18 = vadd.f32 %v2516_v17, %v2468_v15  ;;  %v687_v20 = vpop.f32.mrf.mxu0 }
 0x11f   : > { %v896_v21 = vpop.f32.mrf.mxu1 }
 0x120   : > { %v3030_v22 = vadd.f32 %v896_v21, %v687_v20  ;;  %v2469_v24 = vpop.f32.mrf.mxu0 }
 0x121   : > { %v2517_v25 = vpop.f32.mrf.mxu1 }
 0x122   : > { %v3032_v27 = vadd.f32 %v2517_v25, %v2469_v24  ;;  %v690_v28 = vpop.f32.mrf.mxu0 }
 0x123   : > { %v899_v29 = vpop.f32.mrf.mxu1 }
 0x124   : > { %v3034_v31 = vadd.f32 %v899_v29, %v690_v28  ;;  %v2472_v32 = vpop.f32.mrf.mxu0 }
 0x125   : > { %v2520_v34 = vpop.f32.mrf.mxu1 }
 0x126   : > { %v3036_v35 = vadd.f32 %v2520_v34, %v2472_v32  ;;  %v703_v36 = vpop.f32.mrf.mxu0 }
 0x127   : > { %v912_v38 = vpop.f32.mrf.mxu1 }
 0x128   : > { %v3038_v39 = vadd.f32 %v912_v38, %v703_v36  ;;  %v3040_v41 = vpop.f32.mrf.mxu0 }
 0x129   : > { %v3042_v42 = vpop.f32.mrf.mxu1 }
 0x12a   : > { %v3044_v43 = vpop.f32.mrf.mxu0 }
 0x12b   : > { %v3046_v45 = vpop.f32.mrf.mxu1 }
 0x12c   : > { %v2540_v46 = vpop.f32.mrf.mxu0 }
 0x12d   : > { %v1203_v48 = vadd.f32 %v2540_v46, %v2941_v55  ;;  %v2588_v49 = vpop.f32.mrf.mxu1  ;;  %v3059_v55 = vld [vmem:[%s3227_s2 + $0x8] sm:$0xff] }
 0x12e   : > { %v1074_v51 = vpop.f32.mrf.mxu0 }
 0x12f   : > { %v1509_v52 = vadd.f32 %v2588_v49, %v1203_v48  ;;  %v1201_v53 = vadd.f32 %v1074_v51, %v2943_v58  ;;  %v1380_v56 = vpop.f32.mrf.mxu1 }
 0x130   : > { %v2541_v59 = vpop.f32.mrf.mxu0 }
 0x131   : > { %v1507_v61 = vadd.f32 %v1380_v56, %v1201_v53  ;;  %v1204_v63 = vadd.f32 %v2541_v59, %v2948_v62  ;;  %v2589_v2 = vpop.f32.mrf.mxu1  ;;  %v1543_v7 = vadd.f32 %v3053_v57, %v1509_v52 }
 0x132   : > { %v1077_v3 = vpop.f32.mrf.mxu0 }
 0x133   : > { %v1510_v58 = vadd.f32 %v2589_v2, %v1204_v63  ;;  %v1202_v8 = vadd.f32 %v1077_v3, %v2950_v1  ;;  %v1383_v11 = vpop.f32.mrf.mxu1  ;;  %v1541_v15 = vadd.f32 %v3053_v57, %v1507_v61  ;;  %v1575_v25 = vmax.f32 %v1543_v7, 0.0 }
 0x134   : > { %v2544_v4 = vpop.f32.mrf.mxu0 }
 0x135   : > { %v1544_v17 = vadd.f32 %v3059_v55, %v1510_v58  ;;  %v1508_v20 = vadd.f32 %v1383_v11, %v1202_v8  ;;  %v1207_v62 = vadd.f32 %v2544_v4, %v2953_v5  ;;  %v2592_v21 = vpop.f32.mrf.mxu1  ;;  %v1573_v38 = vmax.f32 %v1541_v15, 0.0 }
 0x136   : > { %v1090_v24 = vpop.f32.mrf.mxu0 }
 0x137   : > { %v1576_v28 = vmax.f32 %v1544_v17, 0.0  ;;  %v1542_v29 = vadd.f32 %v3059_v55, %v1508_v20  ;;  %v1205_v32 = vadd.f32 %v1090_v24, %v2958_v9  ;;  %v1396_v34 = vpop.f32.mrf.mxu1  ;;  %v1513_v36 = vadd.f32 %v2592_v21, %v1207_v62 }
 0x138   : > { %v2545_v1 = vpop.f32.mrf.mxu0 }
 0x139   : > { %v1612_v46 = vmax.f32 %v1575_v25, %v1576_v28  ;;  %v1574_v48 = vmax.f32 %v1542_v29, 0.0  ;;  %v2593_v49 = vpop.f32.mrf.mxu1  ;;  %v1511_v51 = vadd.f32 %v1396_v34, %v1205_v32  ;;  %v1208_v52 = vadd.f32 %v2545_v1, %v2963_v13 }
 0x13a   : > { %v1093_v53 = vpop.f32.mrf.mxu0  ;;  %v1547_v61 = vadd.f32 %v3053_v57, %v1513_v36 }
 0x13b   : > { %v1613_v5 = vrot.slane %v1612_v46, 4  ;;  %v1605_v56 = vmax.f32 %v1573_v38, %v1574_v48  ;;  %v1399_v59 = vpop.f32.mrf.mxu1  ;;  %v1514_v63 = vadd.f32 %v2593_v49, %v1208_v52  ;;  %v1206_v2 = vadd.f32 %v1093_v53, %v2968_v16 }
 0x13c   : > { %v2548_v9 = vpop.f32.mrf.mxu0  ;;  %v1545_v11 = vadd.f32 %v3053_v57, %v1511_v51  ;;  %v3077_v16 = vadd.f32 %v3042_v42, %v3040_v41  ;;  %v1579_v25 = vmax.f32 %v1547_v61, 0.0 }
 0x13d   : > { %v1614_v3 = vmax.f32 %v1612_v46, %v1613_v5  ;;  %v1606_v7 = vrot.slane %v1605_v56, 4  ;;  %v1211_v58 = vadd.f32 %v2548_v9, %v2971_v19  ;;  %v2596_v8 = vpop.f32.mrf.mxu1  ;;  %v1548_v13 = vadd.f32 %v3059_v55, %v1514_v63 }
 0x13e   : > { %v1512_v4 = vadd.f32 %v1399_v59, %v1206_v2  ;;  %v1106_v15 = vpop.f32.mrf.mxu0  ;;  %v1577_v46 = vmax.f32 %v1545_v11, 0.0 }
 0x13f   : > { %v1615_v17 = vrot.slane %v1614_v3, 2  ;;  %v1607_v20 = vmax.f32 %v1605_v56, %v1606_v7  ;;  %v1517_v62 = vadd.f32 %v2596_v8, %v1211_v58  ;;  %v1209_v21 = vadd.f32 %v1106_v15, %v2976_v23  ;;  %v1412_v24 = vpop.f32.mrf.mxu1 }
 0x140   : > { %v1580_v19 = vmax.f32 %v1548_v13, 0.0  ;;  %v1546_v28 = vadd.f32 %v3059_v55, %v1512_v4  ;;  %v2549_v29 = vpop.f32.mrf.mxu0 }
 0x141   : > { %v1616_v32 = vmax.f32 %v1614_v3, %v1615_v17  ;;  %v1608_v34 = vrot.slane %v1607_v20, 2  ;;  %v1551_v36 = vadd.f32 %v3053_v57, %v1517_v62  ;;  %v1515_v1 = vadd.f32 %v1412_v24, %v1209_v21  ;;  %v2597_v38 = vpop.f32.mrf.mxu1 }
 0x142   : > { %v1626_v48 = vmax.f32 %v1579_v25, %v1580_v19  ;;  %v1578_v49 = vmax.f32 %v1546_v28, 0.0  ;;  %v1212_v23 = vadd.f32 %v2549_v29, %v2978_v26  ;;  %v1109_v51 = vpop.f32.mrf.mxu0 }
 0x143   : > { %v1617_v52 = vrot.slane %v1616_v32, 1  ;;  %v1609_v41 = vmax.f32 %v1607_v20, %v1608_v34  ;;  %v1583_v42 = vmax.f32 %v1551_v36, 0.0  ;;  %v1549_v53 = vadd.f32 %v3053_v57, %v1515_v1  ;;  %v1415_v5 = vpop.f32.mrf.mxu1 }
 0x144   : > { %v1627_v56 = vrot.slane %v1626_v48, 4  ;;  %v1619_v59 = vmax.f32 %v1577_v46, %v1578_v49  ;;  %v1518_v61 = vadd.f32 %v2597_v38, %v1212_v23  ;;  %v1210_v63 = vadd.f32 %v1109_v51, %v2984_v30  ;;  %v2552_v2 = vpop.f32.mrf.mxu0 }
 0x145   : > { %v1618_v9 = vmax.f32 %v1616_v32, %v1617_v52  ;;  %v1610_v3 = vrot.slane %v1609_v41, 1  ;;  %v1581_v7 = vmax.f32 %v1549_v53, 0.0  ;;  %v1215_v58 = vadd.f32 %v2552_v2, %v2986_v33  ;;  %v2600_v8 = vpop.f32.mrf.mxu1 }
 0x146   : > { %v1628_v26 = vmax.f32 %v1626_v48, %v1627_v56  ;;  %v1620_v11 = vrot.slane %v1619_v59, 4  ;;  %v1552_v13 = vadd.f32 %v3059_v55, %v1518_v61  ;;  %v1516_v4 = vadd.f32 %v1415_v5, %v1210_v63  ;;  %v1122_v15 = vpop.f32.mrf.mxu0 }
 0x147   : > { %v1718_v17 = vpack.c.bf16 %v1618_v9, %v1618_v9  ;;  %v1611_v20 = vmax.f32 %v1609_v41, %v1610_v3  ;;  %v1521_v62 = vadd.f32 %v2600_v8, %v1215_v58  ;;  %v1213_v21 = vadd.f32 %v1122_v15, %v2992_v37  ;;  %v1428_v30 = vpop.f32.mrf.mxu1 }
 0x148   : > { %v1629_v24 = vrot.slane %v1628_v26, 2  ;;  %v1621_v25 = vmax.f32 %v1619_v59, %v1620_v11  ;;  %v1584_v19 = vmax.f32 %v1552_v13, 0.0  ;;  %v1550_v28 = vadd.f32 %v3059_v55, %v1516_v4  ;;  %v2553_v33 = vpop.f32.mrf.mxu0 }
 0x149   : > { %v1773_v29 = vunpack.c.l.b16 %v1718_v17  ;;  %v1717_v32 = vpack.c.bf16 %v1611_v20, %v1611_v20  ;;  %v1932_v34 = vsel %vm1788_vm1, %v1618_v9, %v1611_v20  ;;  %v1555_v36 = vadd.f32 %v3053_v57, %v1521_v62  ;;  %v2601_v1 = vpop.f32.mrf.mxu1 }
 0x14a   : > { %v1630_v38 = vmax.f32 %v1628_v26, %v1629_v24  ;;  %v1622_v46 = vrot.slane %v1621_v25, 2  ;;  %v1640_v48 = vmax.f32 %v1583_v42, %v1584_v19  ;;  %v1582_v49 = vmax.f32 %v1550_v28, 0.0  ;;  %v1125_v37 = vpop.f32.mrf.mxu0 }
 0x14b   : > { %v1772_v23 = vunpack.c.l.b16 %v1717_v32  ;;  %v1587_v51 = vmax.f32 %v1555_v36, 0.0  ;;  %v1519_v52 = vadd.f32 %v1428_v30, %v1213_v21  ;;  %v1216_v41 = vadd.f32 %v2553_v33, %v2994_v40  ;;  %v1431_v53 = vpop.f32.mrf.mxu1 }
 0x14c   : > { %v1631_v5 = vrot.slane %v1630_v38, 1  ;;  %v1623_v56 = vmax.f32 %v1621_v25, %v1622_v46  ;;  %v1641_v59 = vrot.slane %v1640_v48, 4  ;;  %v1633_v61 = vmax.f32 %v1581_v7, %v1582_v49  ;;  %v2556_v63 = vpop.f32.mrf.mxu0 }
 0x14d   : > { %v1789_v2 = vsel %vm1788_vm1, %v1773_v29, %v1772_v23  ;;  %v1553_v9 = vadd.f32 %v3053_v57, %v1519_v52  ;;  %v1522_v3 = vadd.f32 %v2601_v1, %v1216_v41  ;;  %v1214_v42 = vadd.f32 %v1125_v37, %v3002_v44  ;;  %v2604_v58 = vpop.f32.mrf.mxu1 }
 0x14e   : > { %v1632_v8 = vmax.f32 %v1630_v38, %v1631_v5  ;;  %v1624_v26 = vrot.slane %v1623_v56, 1  ;;  %v1642_v11 = vmax.f32 %v1640_v48, %v1641_v59  ;;  %v1634_v13 = vrot.slane %v1633_v61, 4  ;;  %v1138_v4 = vpop.f32.mrf.mxu0 }
 0x14f   : > { %v1585_v40 = vmax.f32 %v1553_v9, 0.0  ;;  %v1556_v15 = vadd.f32 %v3059_v55, %v1522_v3  ;;  %v1520_v17 = vadd.f32 %v1431_v53, %v1214_v42  ;;  %v1219_v7 = vadd.f32 %v2556_v63, %v3004_v47  ;;  %v1444_v20 = vpop.f32.mrf.mxu1 }
 0x150   : > { %v1720_v62 = vpack.c.bf16 %v1632_v8, %v1632_v8  ;;  %v1625_v21 = vmax.f32 %v1623_v56, %v1624_v26  ;;  %v1643_v30 = vrot.slane %v1642_v11, 2  ;;  %v1635_v24 = vmax.f32 %v1633_v61, %v1634_v13  ;;  %v2557_v25 = vpop.f32.mrf.mxu0 }
 0x151   : > { %v1588_v44 = vmax.f32 %v1556_v15, 0.0  ;;  %v1554_v19 = vadd.f32 %v3059_v55, %v1520_v17  ;;  %v1525_v28 = vadd.f32 %v2604_v58, %v1219_v7  ;;  %v1217_v33 = vadd.f32 %v1138_v4, %v3006_v50  ;;  %v2605_v29 = vpop.f32.mrf.mxu1 }
 0x152   : > { %v1775_v32 = vunpack.c.l.b16 %v1720_v62  ;;  %v1719_v36 = vpack.c.bf16 %v1625_v21, %v1625_v21  ;;  %v1933_v1 = vsel %vm1790_vm2, %v1625_v21, %v1932_v34  ;;  %v1644_v38 = vmax.f32 %v1642_v11, %v1643_v30  ;;  %v1141_v47 = vpop.f32.mrf.mxu0 }
 0x153   : > { %v1636_v46 = vrot.slane %v1635_v24, 2  ;;  %v1934_v48 = vsel %vm1792_vm3, %v1632_v8, %v1933_v1  ;;  %v1654_v49 = vmax.f32 %v1587_v51, %v1588_v44  ;;  %v1586_v37 = vmax.f32 %v1554_v19, 0.0  ;;  %v1447_v23 = vpop.f32.mrf.mxu1 }
 0x154   : > { %v1774_v52 = vunpack.c.l.b16 %v1719_v36  ;;  %v1645_v41 = vrot.slane %v1644_v38, 1  ;;  %v1559_v53 = vadd.f32 %v3053_v57, %v1525_v28  ;;  %v1523_v5 = vadd.f32 %v1444_v20, %v1217_v33  ;;  %v2560_v56 = vpop.f32.mrf.mxu0 }
 0x155   : > { %v1637_v50 = vmax.f32 %v1635_v24, %v1636_v46  ;;  %v1655_v59 = vrot.slane %v1654_v49, 4  ;;  %v1647_v61 = vmax.f32 %v1585_v40, %v1586_v37  ;;  %v1220_v63 = vadd.f32 %v2557_v25, %v3011_v54  ;;  %v2608_v34 = vpop.f32.mrf.mxu1 }
 0x156   : > { %v3104_v9 = vadd.f32 %v3046_v45, %v3044_v43  ;;  %v1791_v51 = vsel %vm1790_vm2, %v1774_v52, %v1789_v2  ;;  %v3107_v3 = vmax.f32 %v1644_v38, %v1645_v41  ;;  %v1557_v42 = vadd.f32 %v3053_v57, %v1523_v5  ;;  %v1154_v58 = vpop.f32.mrf.mxu0 }
 0x157   : > { %v1638_v8 = vrot.slane %v1637_v50, 1  ;;  %v1793_v26 = vsel %vm1792_vm3, %v1775_v32, %v1791_v51  ;;  %v1656_v11 = vmax.f32 %v1654_v49, %v1655_v59  ;;  %v1648_v13 = vrot.slane %v1647_v61, 4  ;;  %v1460_v4 = vpop.f32.mrf.mxu1 }
 0x158   : > { %v1722_v54 = vpack.c.bf16 %v3107_v3, %v3107_v3  ;;  %v1591_v40 = vmax.f32 %v1559_v53, 0.0  ;;  %v1526_v15 = vadd.f32 %v2605_v29, %v1220_v63  ;;  %v1218_v43 = vadd.f32 %v1141_v47, %v3017_v60  ;;  %v2561_v45 = vpop.f32.mrf.mxu0 }
 0x159   : > { %v1639_v2 = vmax.f32 %v1637_v50, %v1638_v8  ;;  %v1657_v17 = vrot.slane %v1656_v11, 2  ;;  %v1649_v7 = vmax.f32 %v1647_v61, %v1648_v13  ;;  %v1223_v20 = vadd.f32 %v2560_v56, %v3019_v0  ;;  %v2609_v62 = vpop.f32.mrf.mxu1 }
 0x15a   : > { %v1589_v21 = vmax.f32 %v1557_v42, 0.0  ;;  %v1560_v30 = vadd.f32 %v3059_v55, %v1526_v15  ;;  %v1524_v24 = vadd.f32 %v1447_v23, %v1218_v43  ;;  %v1221_v25 = vadd.f32 %v1154_v58, %v3022_v6  ;;  %v1157_v44 = vpop.f32.mrf.mxu0 }
 0x15b   : > { %v1721_v19 = vpack.c.bf16 %v1639_v2, %v1639_v2  ;;  %v3118_v28 = vsel %vm1794_vm4, %v1639_v2, %v1934_v48  ;;  %v1658_v33 = vmax.f32 %v1656_v11, %v1657_v17  ;;  %v1650_v60 = vrot.slane %v1649_v7, 2  ;;  %v1463_v29 = vpop.f32.mrf.mxu1 }
 0x15c   : > { %v1592_v32 = vmax.f32 %v1560_v30, 0.0  ;;  %v1558_v36 = vadd.f32 %v3059_v55, %v1524_v24  ;;  %v1529_v1 = vadd.f32 %v2608_v34, %v1223_v20  ;;  %v1527_v0 = vadd.f32 %v1460_v4, %v1221_v25  ;;  %v2564_v38 = vpop.f32.mrf.mxu0 }
 0x15d   : > { %v1776_v47 = vunpack.c.l.b16 %v1721_v19  ;;  %v1659_v46 = vrot.slane %v1658_v33, 1  ;;  %v1651_v49 = vmax.f32 %v1649_v7, %v1650_v60  ;;  %v1224_v37 = vadd.f32 %v2561_v45, %v3024_v10  ;;  %v2612_v6 = vpop.f32.mrf.mxu1 }
 0x15e   : > { %v1668_v23 = vmax.f32 %v1591_v40, %v1592_v32  ;;  %v1590_v52 = vmax.f32 %v1558_v36, 0.0  ;;  %v1563_v48 = vadd.f32 %v3053_v57, %v1529_v1  ;;  %v1561_v41 = vadd.f32 %v3053_v57, %v1527_v0  ;;  %v1170_v53 = vpop.f32.mrf.mxu0 }
 0x15f   : > { %v3125_v5 = vsel %vm1794_vm4, %v1776_v47, %v1793_v26  ;;  %v3127_v56 = vmax.f32 %v1658_v33, %v1659_v46  ;;  %v1652_v50 = vrot.slane %v1651_v49, 1  ;;  %v1530_v59 = vadd.f32 %v2609_v62, %v1224_v37  ;;  %v1476_v61 = vpop.f32.mrf.mxu1 }
 0x160   : > { %v3129_v63 = vunpack.c.l.b16 %v1722_v54  ;;  %v1669_v34 = vrot.slane %v1668_v23, 4  ;;  %v1661_v10 = vmax.f32 %v1589_v21, %v1590_v52  ;;  %v1595_v51 = vmax.f32 %v1563_v48, 0.0  ;;  %v2565_v42 = vpop.f32.mrf.mxu0 }
 0x161   : > { %v1724_v58 = vpack.c.bf16 %v3127_v56, %v3127_v56  ;;  %v3133_v8 = vmax.f32 %v1651_v49, %v1652_v50  ;;  %v1564_v11 = vadd.f32 %v3059_v55, %v1530_v59  ;;  %v1222_v26 = vadd.f32 %v1157_v44, %v3026_v14  ;;  %v2613_v13 = vpop.f32.mrf.mxu1 }
 0x162   : > { %v1670_v4 = vmax.f32 %v1668_v23, %v1669_v34  ;;  %v1662_v40 = vrot.slane %v1661_v10, 4  ;;  %v1227_v15 = vadd.f32 %v2564_v38, %v3028_v18  ;;  %v1225_v54 = vadd.f32 %v1170_v53, %v3030_v22  ;;  %v1173_v43 = vpop.f32.mrf.mxu0 }
 0x163   : > { %v3139_v45 = vunpack.c.l.b16 %v1724_v58  ;;  %v1593_v2 = vmax.f32 %v1561_v41, 0.0  ;;  %v1596_v17 = vmax.f32 %v1564_v11, 0.0  ;;  %v1528_v7 = vadd.f32 %v1463_v29, %v1222_v26  ;;  %v1479_v20 = vpop.f32.mrf.mxu1 }
 0x164   : > { %v1671_v62 = vrot.slane %v1670_v4, 2  ;;  %v1663_v21 = vmax.f32 %v1661_v10, %v1662_v40  ;;  %v1533_v30 = vadd.f32 %v2612_v6, %v1227_v15  ;;  %v1531_v24 = vadd.f32 %v1476_v61, %v1225_v54  ;;  %v2568_v25 = vpop.f32.mrf.mxu0 }
 0x165   : > { %v1723_v14 = vpack.c.bf16 %v3133_v8, %v3133_v8  ;;  %v1682_v44 = vmax.f32 %v1595_v51, %v1596_v17  ;;  %v1562_v18 = vadd.f32 %v3059_v55, %v1528_v7  ;;  %v1228_v22 = vadd.f32 %v2565_v42, %v3032_v27  ;;  %v2616_v38 = vpop.f32.mrf.mxu1 }
 0x166   : > { %v1672_v19 = vmax.f32 %v1670_v4, %v1671_v62  ;;  %v1664_v33 = vrot.slane %v1663_v21, 2  ;;  %v1567_v60 = vadd.f32 %v3053_v57, %v1533_v30  ;;  %v1565_v29 = vadd.f32 %v3053_v57, %v1531_v24  ;;  %v1186_v47 = vpop.f32.mrf.mxu0 }
 0x167   : > { %v1683_v32 = vrot.slane %v1682_v44, 4  ;;  %v1594_v36 = vmax.f32 %v1562_v18, 0.0  ;;  %v1534_v1 = vadd.f32 %v2613_v13, %v1228_v22  ;;  %v1226_v0 = vadd.f32 %v1173_v43, %v3034_v31  ;;  %v1492_v51 = vpop.f32.mrf.mxu1 }
 0x168   : > { %v1673_v46 = vrot.slane %v1672_v19, 1  ;;  %v1665_v49 = vmax.f32 %v1663_v21, %v1664_v33  ;;  %v1599_v37 = vmax.f32 %v1567_v60, 0.0  ;;  %v1597_v6 = vmax.f32 %v1565_v29, 0.0  ;;  %v2569_v42 = vpop.f32.mrf.mxu0 }
 0x169   : > { %v1684_v23 = vmax.f32 %v1682_v44, %v1683_v32  ;;  %v1675_v52 = vmax.f32 %v1593_v2, %v1594_v36  ;;  %v1568_v27 = vadd.f32 %v3059_v55, %v1534_v1  ;;  %v1532_v48 = vadd.f32 %v1479_v20, %v1226_v0  ;;  %v2617_v21 = vpop.f32.mrf.mxu1 }
 0x16a   : > { %v1674_v41 = vmax.f32 %v1672_v19, %v1673_v46  ;;  %v1666_v53 = vrot.slane %v1665_v49, 1  ;;  %v1231_v50 = vadd.f32 %v2568_v25, %v3036_v35  ;;  %v1229_v59 = vadd.f32 %v1186_v47, %v3038_v39  ;;  %v1189_v30 = vpop.f32.mrf.mxu0 }
 0x16b   : > { %v1685_v61 = vrot.slane %v1684_v23, 2  ;;  %v1676_v31 = vrot.slane %v1675_v52, 4  ;;  %v1600_v34 = vmax.f32 %v1568_v27, 0.0  ;;  %v1566_v10 = vadd.f32 %v3059_v55, %v1532_v48  ;;  %v1495_v46 = vpop.f32.mrf.mxu1 }
 0x16c   : > { %v1726_v58 = vpack.c.bf16 %v1674_v41, %v1674_v41  ;;  %v1667_v11 = vmax.f32 %v1665_v49, %v1666_v53  ;;  %v1537_v26 = vadd.f32 %v2616_v38, %v1231_v50  ;;  %v1535_v13 = vadd.f32 %v1492_v51, %v1229_v59 }
 0x16d   : > { %v1686_v4 = vmax.f32 %v1684_v23, %v1685_v61  ;;  %v1677_v40 = vmax.f32 %v1675_v52, %v1676_v31  ;;  %v1696_v15 = vmax.f32 %v1599_v37, %v1600_v34  ;;  %v1598_v54 = vmax.f32 %v1566_v10, 0.0 }
 0x16e   : > { %v1778_v43 = vunpack.c.l.b16 %v1723_v14  ;;  %v1725_v35 = vpack.c.bf16 %v1667_v11, %v1667_v11  ;;  %v1939_v39 = vsel %vm1788_vm1, %v1674_v41, %v1667_v11  ;;  %v1571_v2 = vadd.f32 %v3053_v57, %v1537_v26 }
 0x16f   : > { %v1687_v17 = vrot.slane %v1686_v4, 1  ;;  %v1678_v7 = vrot.slane %v1677_v40, 2  ;;  %v1697_v20 = vrot.slane %v1696_v15, 4  ;;  %v1689_v62 = vmax.f32 %v1597_v6, %v1598_v54 }
 0x170   : > { %v1781_v24 = vunpack.c.l.b16 %v1726_v58  ;;  %v1780_v25 = vunpack.c.l.b16 %v1725_v35  ;;  %v1569_v44 = vadd.f32 %v3053_v57, %v1535_v13  ;;  %v1232_v18 = vadd.f32 %v2569_v42, %v3077_v16 }
 0x171   : > { %v1688_v22 = vmax.f32 %v1686_v4, %v1687_v17  ;;  %v1679_v14 = vmax.f32 %v1677_v40, %v1678_v7  ;;  %v1698_v19 = vmax.f32 %v1696_v15, %v1697_v20  ;;  %v1690_v33 = vrot.slane %v1689_v62, 4 }
 0x172   : > { %v1802_v60 = vsel %vm1788_vm1, %v1781_v24, %v1780_v25  ;;  %v1603_v29 = vmax.f32 %v1571_v2, 0.0  ;;  %v1538_v32 = vadd.f32 %v2617_v21, %v1232_v18  ;;  %v1230_v36 = vadd.f32 %v1189_v30, %v3104_v9 }
 0x173   : > { %v1680_v1 = vrot.slane %v1679_v14, 1  ;;  %v1699_v0 = vrot.slane %v1698_v19, 2  ;;  %v1691_v38 = vmax.f32 %v1689_v62, %v1690_v33  ;;  %v1601_v47 = vmax.f32 %v1569_v44, 0.0 }
 0x174   : > { %v1572_v49 = vadd.f32 %v3059_v55, %v1538_v32  ;;  %v1536_v57 = vadd.f32 %v1495_v46, %v1230_v36  ;;  %v1797_v16 = vsel %vm1796_vm5, %v3129_v63, %v3125_v5  ;;  %v1936_v37 = vsel %vm1796_vm5, %v3107_v3, %v3118_v28  ;;  %v2730_v46 = vld [vmem:[%s3230_s5 + $0x8] sm:$0xff]  }
 0x175   : > { %v1728_v6 = vpack.c.bf16 %v1688_v22, %v1688_v22  ;;  %v1681_v23 = vmax.f32 %v1679_v14, %v1680_v1  ;;  %v1700_v52 = vmax.f32 %v1698_v19, %v1699_v0  ;;  %v1692_v9 = vrot.slane %v1691_v38, 2  ;;  %v2726_v1 = vld [vmem:[%s3230_s5 + $0x28] sm:$0xff]   ;;  %v2727_v0 = vld [vmem:[%s3230_s5 + $0x20] sm:$0xff]  }
 0x176   : > { %v1604_v27 = vmax.f32 %v1572_v49, 0.0  ;;  %v1570_v48 = vadd.f32 %v3059_v55, %v1536_v57  ;;  %v1799_v41 = vsel %vm1798_vm6, %v1778_v43, %v1797_v16  ;;  %v1937_v53 = vsel %vm1798_vm6, %v3133_v8, %v1936_v37  ;;  %2643 = vmatpush3.bf16.msra.mxu1 %v2726_v1  ;;  %v2731_v49 = vld [vmem:[%s3230_s5] sm:$0xff]  }
 0x177   : > { %v1727_v50 = vpack.c.bf16 %v1681_v23, %v1681_v23  ;;  %v1940_v59 = vsel %vm1790_vm2, %v1681_v23, %v1939_v39  ;;  %v1701_v5 = vrot.slane %v1700_v52, 1  ;;  %v1693_v63 = vmax.f32 %v1691_v38, %v1692_v9  ;;  %2644 = vmatprep.subr.bf16.mxu1 %v2960_v12  ;;  %v2728_v38 = vld [vmem:[%s3230_s5 + $0x18] sm:$0xff]   ;;  %v2213_v57 = vld [vmem:[%s3229_s4] ss:$0 sm:$0xff] }
 0x178   : > { %v1941_v61 = vsel %vm1792_vm3, %v1688_v22, %v1940_v59  ;;  %v1710_v3 = vmax.f32 %v1603_v29, %v1604_v27  ;;  %v1602_v28 = vmax.f32 %v1570_v48, 0.0  ;;  %v1801_v31 = vsel %vm1800_vm7, %v3139_v45, %v1799_v41 }
 0x179   : > { %v1782_v34 = vunpack.c.l.b16 %v1727_v50  ;;  %v1702_v10 = vmax.f32 %v1700_v52, %v1701_v5  ;;  %v1694_v55 = vrot.slane %v1693_v63, 1  ;;  %v3175_v51 = vsel %vm1800_vm7, %v3127_v56, %v1937_v53 }
 0x17a   : > { %v1783_v8 = vunpack.c.l.b16 %v1728_v6  ;;  %v1711_v42 = vrot.slane %v1710_v3, 4  ;;  %v1703_v58 = vmax.f32 %v1601_v47, %v1602_v28  ;;  %2645 = vmatpush3.bf16.msra.mxu1 %v2727_v0  ;;  %v2729_v47 = vld [vmem:[%s3230_s5 + $0x10] sm:$0xff]  }
 0x17b   : > { %v1803_v11 = vsel %vm1790_vm2, %v1782_v34, %v1802_v60  ;;  %v1695_v26 = vmax.f32 %v1693_v63, %v1694_v55  ;;  %v1730_v13 = vpack.c.bf16 %v1702_v10, %v1702_v10  ;;  %2646 = vmatprep.subr.bf16.mxu1 %v2960_v12 }
 0x17c   : > { %v1804_v4 = vsel %vm1792_vm3, %v1783_v8, %v1803_v11  ;;  %v1712_v40 = vmax.f32 %v1710_v3, %v1711_v42  ;;  %v1704_v15 = vrot.slane %v1703_v58, 4 }
 0x17d   : > { %v1729_v54 = vpack.c.bf16 %v1695_v26, %v1695_v26  ;;  %v1942_v45 = vsel %vm1794_vm4, %v1695_v26, %v1941_v61  ;;  %v1785_v2 = vunpack.c.l.b16 %v1730_v13  ;;  %v2222_v13 = vld [vmem:[%s3231_s6] ss:$0 sm:$0xff] }
 0x17e   : > { %v1713_v43 = vrot.slane %v1712_v40, 2  ;;  %v1705_v35 = vmax.f32 %v1703_v58, %v1704_v15  ;;  %v1943_v39 = vsel %vm1796_vm5, %v1702_v10, %v1942_v45  ;;  %2647 = vmatpush3.bf16.msra.mxu1 %v2728_v38 }
 0x17f   : > { %v1784_v56 = vunpack.c.l.b16 %v1729_v54  ;;  %2648 = vmatprep.subr.bf16.mxu1 %v2960_v12 }
 0x180   : > { %v1714_v17 = vmax.f32 %v1712_v40, %v1713_v43  ;;  %v1706_v7 = vrot.slane %v1705_v35, 2 }
 0x181   : > { %v1805_v20 = vsel %vm1794_vm4, %v1784_v56, %v1804_v4 }
 0x182   : > { %v1715_v62 = vrot.slane %v1714_v17, 1  ;;  %v1707_v21 = vmax.f32 %v1705_v35, %v1706_v7  ;;  %v1806_v30 = vsel %vm1796_vm5, %v1785_v2, %v1805_v20  ;;  %2649 = vmatpush3.bf16.msra.mxu1 %v2729_v47 }
 0x183   : > { %2650 = vmatprep.subr.bf16.mxu1 %v2960_v12 }
 0x184   : > { %v1716_v24 = vmax.f32 %v1714_v17, %v1715_v62  ;;  %v1708_v25 = vrot.slane %v1707_v21, 1 }
 0x186   : > { %v1709_v44 = vmax.f32 %v1707_v21, %v1708_v25  ;;  %v1732_v18 = vpack.c.bf16 %v1716_v24, %v1716_v24  ;;  %2651 = vmatpush3.bf16.msra.mxu1 %v2730_v46 }
 0x187   : > { %2652 = vmatprep.subr.bf16.mxu1 %v2960_v12 }
 0x188   : > { %v1731_v22 = vpack.c.bf16 %v1709_v44, %v1709_v44  ;;  %v1944_v14 = vsel %vm1798_vm6, %v1709_v44, %v1943_v39  ;;  %v1787_v60 = vunpack.c.l.b16 %v1732_v18 }
 0x189   : > { %v1945_v19 = vsel %vm1800_vm7, %v1716_v24, %v1944_v14 }
 0x18a   : > { %v1786_v33 = vunpack.c.l.b16 %v1731_v22  ;;  %2653 = vmatpush3.bf16.msra.mxu1 %v2731_v49 }
 0x18c   : > { %v1807_v29 = vsel %vm1798_vm6, %v1786_v33, %v1806_v30 }
 0x18d   : > { %v1808_v32 = vsel %vm1800_vm7, %v1787_v60, %v1807_v29 }
 0x18e   : > { %v1809_v36 = vpack.c.b16 %v1808_v32, %v1801_v31 }
 0x190   : > { %2635 = vmatmul.mubr.bf16.vlgmr.msra.gmra.mxu0 %v1809_v36 }
 0x250   : > { %v1893_v16 = vpop.f32.mrf.mxu0 }
 0x251   : > { %v1894_v37 = vadd.f32 %v2213_v57, %v1893_v16 }
 0x252   : > { %v2636_v6 = vpop.f32.mrf.mxu0 }
 0x253   : > { %v1900_v23 = vsub.f32 0.0, %v1894_v37  ;;  %v1910_v28 = vmax.f32 %v1894_v37, 0.0 }
 0x254   : > { %v1896_v52 = vpop.f32.mrf.mxu0 }
 0x255   : > { %v1902_v9 = vmul.f32 1.442695, %v1900_v23  ;;  %v1897_v27 = vadd.f32 %v2213_v57, %v1896_v52 }
 0x256   : > { %v2637_v48 = vpop.f32.mrf.mxu0 }
 0x257   : > { %2732 = vpow2.f32 %v1902_v9  ;;  %v1901_v41 = vsub.f32 0.0, %v1897_v27  ;;  %v1911_v34 = vmax.f32 %v1897_v27, 0.0 }
 0x259   : > { %v1904_v53 = vmul.f32 1.442695, %v1901_v41 }
 0x25b   : > { %2734 = vpow2.f32 %v1904_v53 }
 0x264   : > { %v2733_v50 = vpop.eup %2732 }
 0x265   : > { %v1906_v59 = vadd.f32 1.0, %v2733_v50 }
 0x267   : > { %2736 = vrcp.f32 %v1906_v59 }
 0x268   : > { %v2735_v12 = vpop.eup %2734 }
 0x269   : > { %v1907_v5 = vadd.f32 1.0, %v2735_v12 }
 0x26b   : > { %2738 = vrcp.f32 %v1907_v5 }
 0x274   : > { %v2737_v63 = vpop.eup %2736 }
 0x275   : > { %v1914_v61 = vsub.f32 1.0, %v2737_v63  ;;  %v1912_v55 = vmul.f32 %v2737_v63, %v1910_v28 }
 0x277   : > { %v1948_v31 = vmul.f32 %v3175_v51, %v1914_v61 }
 0x278   : > { %v2739_v3 = vpop.eup %2738 }
 0x279   : > { %v1915_v10 = vsub.f32 1.0, %v2739_v3  ;;  %v1913_v8 = vmul.f32 %v2739_v3, %v1911_v34  ;;  %v1950_v58 = vadd.f32 %v1948_v31, %v1912_v55 }
 0x27b   : > { %v1949_v42 = vmul.f32 %v1945_v19, %v1915_v10 }
 0x27d   : > { %v1951_v11 = vadd.f32 %v1949_v42, %v1913_v8 }
 0x27f   : > { %v1952_v26 = vpack.c.bf16 %v1951_v11, %v1950_v58 }
 0x281   : > { %2655 = vmatmul.mubr.bf16.vlgmr.msra.gmra.mxu1 %v1952_v26 }
 0x341   : > { %v2058_v51 = vpop.f32.mrf.mxu1 }
 0x342   : > { %v2059_v4 = vadd.f32 %v2222_v13, %v2058_v51 }
 0x343   : > { %v2656_v40 = vpop.f32.mrf.mxu1 }
 0x344   : > { %2066 = vst.msk [vmem:[%s280_s12] sm:$0xff] %vm2065_vm8, %v2059_v4 }
 0x345   : > { %v2061_v15 = vpop.f32.mrf.mxu1 }
 0x346   : > { %v2062_v54 = vadd.f32 %v2222_v13, %v2061_v15 }
 0x347   : > { %v2657_v45 = vpop.f32.mrf.mxu1 }
 0x348   : > { %2067 = vst.msk [vmem:[%s280_s12 + $0x8] sm:$0xff] %vm2065_vm8, %v2062_v54 }
 0x349 PF: > { %s17_s24 = sadd.s32 1, %s2747_s24  }
 0x34a   : > { %p14_p5 = scmp.ge.s32.totalorder %s17_s24, 4  }
 0x34c   :  { %16 = sbr.rel (!%p14_p5) target bundleno = 1 (0x1), region = 81 }

</bundles_post_ra>
